<compile_context>
chip_gen: v7x
topology: tpu7x:2x2x1
jax: 0.10.0
libtpu: 0.0.40
codegen_flags: <defaults>
</compile_context>

<pallas_src>
import jax
import jax.numpy as jnp
from jax import lax
from jax.experimental import pallas as pl
from jax.experimental.pallas import tpu as pltpu

N_ROUTING_ITERS = 10
_EPS = 1e-12  # avoids the 0/0 NaN of the literal squash when ||sj|| == 0 (benign deviation)


def _routing_kernel(u_cn_ref, u_bc_ref, p_ref, pt_ref, out_ref):
    """One capsule unit's 10 routing iterations.  All intermediates are [1, *] rows."""
    N, BC = u_cn_ref.shape          # in_caps, B*Cout
    u_dtype = u_cn_ref.dtype

    def routing_step(c_row):        # c_row: [1, N] f32
        # sj[b*Cout+d] = sum_n c[n] * u[b,n,d]  — natural [1,N] x [N,BC] MXU matvec
        # (u's contraction dim is on sublanes; no transpose of the big operand).
        sj = jnp.dot(c_row.astype(u_dtype), u_cn_ref[...],
                     preferred_element_type=jnp.float32)                     # [1, BC]
        # Per-batch ||sj||^2 via the one-hot membership matrix (replaces dense G).
        nsq_b = jnp.dot(sj * sj, p_ref[...],
                        preferred_element_type=jnp.float32)                  # [1, B]
        # squash scale per batch: ||s|| / (1 + ||s||^2); sqrt + approx-recip on the EUP.
        scale_b = jnp.sqrt(nsq_b + _EPS) * pl.reciprocal(1.0 + nsq_b, approx=True)
        # Broadcast each batch's scale back onto its Cout lanes (skinny MXU matvec).
        vj = sj * jnp.dot(scale_b, pt_ref[...],
                          preferred_element_type=jnp.float32)                # [1, BC]
        # coeff update: upd[n] = sum_b <u[b,n,:], vj[b,:]>  — natural [1,BC] x [BC,N].
        upd = jnp.dot(vj.astype(u_dtype), u_bc_ref[...],
                      preferred_element_type=jnp.float32)                    # [1, N]
        return vj, upd

    # Iteration 0: coeffs start as all-ones, so softmax(coeffs) == 1/N exactly;
    # start from the compile-time constant and skip the exp/reduce pass.
    vj, upd = routing_step(jnp.full((1, N), 1.0 / N, dtype=jnp.float32))
    coeffs = 1.0 + upd                                                       # [1, N] f32

    def body(_, carry):
        coeffs, _vj = carry
        m = jnp.max(coeffs, axis=1, keepdims=True)
        e = jnp.exp(coeffs - m)
        c_row = e * pl.reciprocal(jnp.sum(e, axis=1, keepdims=True), approx=True)
        vj, upd = routing_step(c_row)
        return coeffs + upd, vj

    _, vj = lax.fori_loop(1, N_ROUTING_ITERS, body, (coeffs, vj), unroll=True)
    out_ref[...] = vj.astype(out_ref.dtype)                                  # lane-dense [1, BC]


def capsule_layer(x, w_stack, b_stack, *, u_dtype=jnp.float32):
    """Fused forward of `num_units` CapsuleUnits sharing the same input.

    x:       [B, in_caps, in_channels]
    w_stack: [num_units, in_channels, out_channels]
    b_stack: [num_units, out_channels]
    returns  [num_units, B, out_channels]
    """
    B, N, _Cin = x.shape
    U, _, Cout = w_stack.shape
    BC = B * Cout

    # ---- hoisted linear: one XLA GEMM for all fused units (review item #1) ----------
    u = jnp.einsum("bnc,ucd->ubnd", x, w_stack,
                   precision=lax.Precision.HIGHEST) + b_stack[:, None, None, :]
    # Both routing layouts are built ONCE here; nothing is relayouted inside the loop.
    u_cn = jnp.transpose(u, (0, 2, 1, 3)).reshape(U, N, BC).astype(u_dtype)   # [U, N, B*Cout]
    u_bc = jnp.transpose(u, (0, 1, 3, 2)).reshape(U, BC, N).astype(u_dtype)   # [U, B*Cout, N]

    # One-hot batch-membership matrix and its transpose (replaces the dense G matrix).
    grp = jnp.arange(BC, dtype=jnp.int32) // Cout
    P = (grp[:, None] == jnp.arange(B, dtype=jnp.int32)[None, :]).astype(jnp.float32)  # [BC, B]
    PT = jnp.transpose(P)                                                               # [B, BC]

    itemsize = jnp.dtype(u_dtype).itemsize
    # Per-grid-step residency: both u layouts (double-buffered by the pipeline) + P/PT.
    # At real sizes on v7x (64 MiB physical) prefer u_dtype=bf16 to keep this small.
    vmem_need = 4 * N * BC * itemsize + 4 * BC * B * 4 + (2 << 20)
    vmem_limit = int(min(96 * 2**20, max(32 * 2**20, vmem_need)))

    cost = pl.CostEstimate(
        flops=U * N_ROUTING_ITERS * (4 * N * BC + 4 * B * BC),
        transcendentals=U * N_ROUTING_ITERS * (N + 2 * B + 2),
        bytes_accessed=2 * U * N * BC * itemsize + 2 * BC * B * 4 + U * BC * 4,
    )

    out = pl.pallas_call(
        _routing_kernel,
        grid=(U,),                                                   # unit axis
        in_specs=[
            pl.BlockSpec((None, N, BC), lambda uu: (uu, 0, 0)),      # u_cn  [N, BC]
            pl.BlockSpec((None, BC, N), lambda uu: (uu, 0, 0)),      # u_bc  [BC, N]
            pl.BlockSpec((BC, B), lambda uu: (0, 0)),                # P   (shared)
            pl.BlockSpec((B, BC), lambda uu: (0, 0)),                # P^T (shared)
        ],
        out_specs=pl.BlockSpec((None, 1, BC), lambda uu: (uu, 0, 0)),
        out_shape=jax.ShapeDtypeStruct((U, 1, BC), jnp.float32),
        compiler_params=pltpu.CompilerParams(
            dimension_semantics=("parallel",),   # independent units -> both v7x TCs
            vmem_limit_bytes=vmem_limit),
        cost_estimate=cost,
    )(u_cn, u_bc, P, PT)

    return out.reshape(U, B, Cout)


def capsule_unit(x, w, bias, **kwargs):
    """Single CapsuleUnit forward, matching the PyTorch module's interface.
    x: [B, in_caps, in_channels]; w: [in_channels, out_channels]; bias: [1, out_channels]."""
    Cout = w.shape[1]
    return capsule_layer(x, w[None], bias.reshape(1, Cout), **kwargs)[0]


def capsule_unit_ref(x, w, bias):
    """Pure-JAX reference of the intended CapsuleUnit forward (f32, HIGHEST precision)."""
    B, N, _ = x.shape
    hp = lax.Precision.HIGHEST
    u = jnp.einsum("bnc,cd->bnd", x, w, precision=hp) + bias.reshape(1, 1, -1)
    coeffs = jnp.ones((1, N, 1), jnp.float32)
    vj = None
    for _ in range(N_ROUTING_ITERS):
        c = jax.nn.softmax(coeffs, axis=1)                   # [1, N, 1]
        sj = jnp.sum(u * c, axis=1)                          # [B, Cout]
        nsq = jnp.sum(sj * sj, axis=-1, keepdims=True)
        vj = sj * nsq / ((1.0 + nsq) * jnp.sqrt(nsq))
        agree = jnp.einsum("bnc,bc->bn", u, vj, precision=hp)
        coeffs = coeffs + jnp.sum(agree, axis=0)[None, :, None]
    return vj


if __name__ == "__main__":
    key = jax.random.PRNGKey(0)
    B, N, Cin, Cout, U = 2, 8, 32, 16, 3     # batch, in_caps, in_channels, out_channels, units
    kx, kw, kb = jax.random.split(key, 3)

    x = jax.random.normal(kx, (B, N, Cin), jnp.float32)
    # Deterministic synthetic Linear parameters (shapes from nn.Linear(in_channels, out_channels)),
    # one (W, b) per fused capsule unit.
    w_stack = jax.random.normal(kw, (U, Cin, Cout), jnp.float32) / jnp.sqrt(jnp.float32(Cin))
    b_stack = 0.01 * jax.random.normal(kb, (U, Cout), jnp.float32)

    # Fused multi-unit call: one pallas_call, unit index on a "parallel" grid axis.
    out_layer = capsule_layer(x, w_stack, b_stack)
    jax.block_until_ready(out_layer)
    assert out_layer.shape == (U, B, Cout)

    # Single-unit call matching the original module's forward signature.
    out_unit = capsule_unit(x, w_stack[0], b_stack[0:1])
    jax.block_until_ready(out_unit)
    assert out_unit.shape == (B, Cout)

    ref_layer = jnp.stack(
        [capsule_unit_ref(x, w_stack[k], b_stack[k:k + 1]) for k in range(U)])

    # Tolerance: MXU contractions change summation order and the kernel uses EUP
    # approx-reciprocal for the softmax/squash; 10 routing iterations amplify rounding.
    assert jnp.allclose(out_layer, ref_layer, atol=3e-3, rtol=3e-3), "layer mismatch vs reference"
    assert jnp.allclose(out_unit, ref_layer[0], atol=3e-3, rtol=3e-3), "unit mismatch vs reference"

    print("KERNEL_OK")
</pallas_src>

<mosaic_0001>
module attributes {stable_mosaic.version = 11 : i64} {
  func.func @_routing_kernel(%arg0: i32, %arg1: memref<1x8x32xf32, #tpu.memory_space<vmem>>, %arg2: memref<1x32x8xf32, #tpu.memory_space<vmem>>, %arg3: memref<32x2xf32, #tpu.memory_space<vmem>>, %arg4: memref<2x32xf32, #tpu.memory_space<vmem>>, %arg5: memref<1x1x32xf32, #tpu.memory_space<vmem>>) attributes {dimension_semantics = [#tpu.dimension_semantics<parallel>], iteration_bounds = array<i64: 3>, scalar_prefetch = 0 : i64, scratch_operands = 0 : i64, tpu.core_type = #tpu.core_type<tc>, window_params = [{transform_indices = @transform_0, window_bounds = array<i64: 1, 8, 32>}, {transform_indices = @transform_1, window_bounds = array<i64: 1, 32, 8>}, {pipeline_mode = #tpu.pipeline_mode<synchronous>, transform_indices = @transform_2, window_bounds = array<i64: 32, 2>}, {pipeline_mode = #tpu.pipeline_mode<synchronous>, transform_indices = @transform_3, window_bounds = array<i64: 2, 32>}, {transform_indices = @transform_4, window_bounds = array<i64: 1, 1, 32>}]} {
    %cst = arith.constant 1.250000e-01 : f32
    %0 = vector.broadcast %cst : f32 to vector<1x8xf32>
    %c0 = arith.constant 0 : index
    %c0_0 = arith.constant 0 : index
    %c0_1 = arith.constant 0 : index
    %1 = vector.load %arg1[%c0, %c0_0, %c0_1] : memref<1x8x32xf32, #tpu.memory_space<vmem>>, vector<1x8x32xf32>
    %2 = vector.shape_cast %1 : vector<1x8x32xf32> to vector<8x32xf32>
    %cst_2 = arith.constant dense<0.000000e+00> : vector<1x32xf32>
    %3 = tpu.matmul %0, %2, %cst_2 {dimension_numbers = #tpu.dot_dimension_numbers<[1], [0], [0], [1], [0, 0, 1, 1], [], []>} : vector<1x8xf32>, vector<8x32xf32>, vector<1x32xf32> -> vector<1x32xf32>
    %4 = arith.mulf %3, %3 : vector<1x32xf32>
    %c0_3 = arith.constant 0 : index
    %c0_4 = arith.constant 0 : index
    %5 = vector.load %arg3[%c0_3, %c0_4] : memref<32x2xf32, #tpu.memory_space<vmem>>, vector<32x2xf32>
    %cst_5 = arith.constant dense<0.000000e+00> : vector<1x2xf32>
    %6 = tpu.matmul %4, %5, %cst_5 {dimension_numbers = #tpu.dot_dimension_numbers<[1], [0], [0], [1], [0, 0, 1, 1], [], []>} : vector<1x32xf32>, vector<32x2xf32>, vector<1x2xf32> -> vector<1x2xf32>
    %cst_6 = arith.constant 9.99999996E-13 : f32
    %7 = vector.broadcast %cst_6 : f32 to vector<1x2xf32>
    %8 = arith.addf %6, %7 : vector<1x2xf32>
    %9 = math.sqrt %8 : vector<1x2xf32>
    %cst_7 = arith.constant 1.000000e+00 : f32
    %10 = vector.broadcast %cst_7 : f32 to vector<1x2xf32>
    %11 = arith.addf %10, %6 : vector<1x2xf32>
    %12 = tpu.reciprocal %11 {approx = true} : vector<1x2xf32> -> vector<1x2xf32>
    %13 = arith.mulf %9, %12 : vector<1x2xf32>
    %c0_8 = arith.constant 0 : index
    %c0_9 = arith.constant 0 : index
    %14 = vector.load %arg4[%c0_8, %c0_9] : memref<2x32xf32, #tpu.memory_space<vmem>>, vector<2x32xf32>
    %cst_10 = arith.constant dense<0.000000e+00> : vector<1x32xf32>
    %15 = tpu.matmul %13, %14, %cst_10 {dimension_numbers = #tpu.dot_dimension_numbers<[1], [0], [0], [1], [0, 0, 1, 1], [], []>} : vector<1x2xf32>, vector<2x32xf32>, vector<1x32xf32> -> vector<1x32xf32>
    %16 = arith.mulf %3, %15 : vector<1x32xf32>
    %c0_11 = arith.constant 0 : index
    %c0_12 = arith.constant 0 : index
    %c0_13 = arith.constant 0 : index
    %17 = vector.load %arg2[%c0_11, %c0_12, %c0_13] : memref<1x32x8xf32, #tpu.memory_space<vmem>>, vector<1x32x8xf32>
    %18 = vector.shape_cast %17 : vector<1x32x8xf32> to vector<32x8xf32>
    %cst_14 = arith.constant dense<0.000000e+00> : vector<1x8xf32>
    %19 = tpu.matmul %16, %18, %cst_14 {dimension_numbers = #tpu.dot_dimension_numbers<[1], [0], [0], [1], [0, 0, 1, 1], [], []>} : vector<1x32xf32>, vector<32x8xf32>, vector<1x8xf32> -> vector<1x8xf32>
    %cst_15 = arith.constant 1.000000e+00 : f32
    %20 = vector.broadcast %cst_15 : f32 to vector<1x8xf32>
    %21 = arith.addf %20, %19 : vector<1x8xf32>
    %c0_i32 = arith.constant 0 : i32
    %cst_16 = arith.constant dense<0xFF800000> : vector<1xf32>
    %22 = vector.multi_reduction <maximumf>, %21, %cst_16 [1] : vector<1x8xf32> to vector<1xf32>
    %23 = vector.shape_cast %22 : vector<1xf32> to vector<1x1xf32>
    %24 = vector.broadcast %23 : vector<1x1xf32> to vector<1x8xf32>
    %25 = arith.subf %21, %24 : vector<1x8xf32>
    %26 = math.exp %25 : vector<1x8xf32>
    %cst_17 = arith.constant dense<0.000000e+00> : vector<1xf32>
    %27 = vector.multi_reduction <add>, %26, %cst_17 [1] : vector<1x8xf32> to vector<1xf32>
    %28 = vector.shape_cast %27 : vector<1xf32> to vector<1x1xf32>
    %29 = tpu.reciprocal %28 {approx = true} : vector<1x1xf32> -> vector<1x1xf32>
    %30 = vector.broadcast %29 : vector<1x1xf32> to vector<1x8xf32>
    %31 = arith.mulf %26, %30 : vector<1x8xf32>
    %c0_18 = arith.constant 0 : index
    %c0_19 = arith.constant 0 : index
    %c0_20 = arith.constant 0 : index
    %32 = vector.load %arg1[%c0_18, %c0_19, %c0_20] : memref<1x8x32xf32, #tpu.memory_space<vmem>>, vector<1x8x32xf32>
    %33 = vector.shape_cast %32 : vector<1x8x32xf32> to vector<8x32xf32>
    %cst_21 = arith.constant dense<0.000000e+00> : vector<1x32xf32>
    %34 = tpu.matmul %31, %33, %cst_21 {dimension_numbers = #tpu.dot_dimension_numbers<[1], [0], [0], [1], [0, 0, 1, 1], [], []>} : vector<1x8xf32>, vector<8x32xf32>, vector<1x32xf32> -> vector<1x32xf32>
    %35 = arith.mulf %34, %34 : vector<1x32xf32>
    %c0_22 = arith.constant 0 : index
    %c0_23 = arith.constant 0 : index
    %36 = vector.load %arg3[%c0_22, %c0_23] : memref<32x2xf32, #tpu.memory_space<vmem>>, vector<32x2xf32>
    %cst_24 = arith.constant dense<0.000000e+00> : vector<1x2xf32>
    %37 = tpu.matmul %35, %36, %cst_24 {dimension_numbers = #tpu.dot_dimension_numbers<[1], [0], [0], [1], [0, 0, 1, 1], [], []>} : vector<1x32xf32>, vector<32x2xf32>, vector<1x2xf32> -> vector<1x2xf32>
    %cst_25 = arith.constant 9.99999996E-13 : f32
    %38 = vector.broadcast %cst_25 : f32 to vector<1x2xf32>
    %39 = arith.addf %37, %38 : vector<1x2xf32>
    %40 = math.sqrt %39 : vector<1x2xf32>
    %cst_26 = arith.constant 1.000000e+00 : f32
    %41 = vector.broadcast %cst_26 : f32 to vector<1x2xf32>
    %42 = arith.addf %41, %37 : vector<1x2xf32>
    %43 = tpu.reciprocal %42 {approx = true} : vector<1x2xf32> -> vector<1x2xf32>
    %44 = arith.mulf %40, %43 : vector<1x2xf32>
    %c0_27 = arith.constant 0 : index
    %c0_28 = arith.constant 0 : index
    %45 = vector.load %arg4[%c0_27, %c0_28] : memref<2x32xf32, #tpu.memory_space<vmem>>, vector<2x32xf32>
    %cst_29 = arith.constant dense<0.000000e+00> : vector<1x32xf32>
    %46 = tpu.matmul %44, %45, %cst_29 {dimension_numbers = #tpu.dot_dimension_numbers<[1], [0], [0], [1], [0, 0, 1, 1], [], []>} : vector<1x2xf32>, vector<2x32xf32>, vector<1x32xf32> -> vector<1x32xf32>
    %47 = arith.mulf %34, %46 : vector<1x32xf32>
    %c0_30 = arith.constant 0 : index
    %c0_31 = arith.constant 0 : index
    %c0_32 = arith.constant 0 : index
    %48 = vector.load %arg2[%c0_30, %c0_31, %c0_32] : memref<1x32x8xf32, #tpu.memory_space<vmem>>, vector<1x32x8xf32>
    %49 = vector.shape_cast %48 : vector<1x32x8xf32> to vector<32x8xf32>
    %cst_33 = arith.constant dense<0.000000e+00> : vector<1x8xf32>
    %50 = tpu.matmul %47, %49, %cst_33 {dimension_numbers = #tpu.dot_dimension_numbers<[1], [0], [0], [1], [0, 0, 1, 1], [], []>} : vector<1x32xf32>, vector<32x8xf32>, vector<1x8xf32> -> vector<1x8xf32>
    %51 = arith.addf %21, %50 : vector<1x8xf32>
    %c1_i32 = arith.constant 1 : i32
    %cst_34 = arith.constant dense<0xFF800000> : vector<1xf32>
    %52 = vector.multi_reduction <maximumf>, %51, %cst_34 [1] : vector<1x8xf32> to vector<1xf32>
    %53 = vector.shape_cast %52 : vector<1xf32> to vector<1x1xf32>
    %54 = vector.broadcast %53 : vector<1x1xf32> to vector<1x8xf32>
    %55 = arith.subf %51, %54 : vector<1x8xf32>
    %56 = math.exp %55 : vector<1x8xf32>
    %cst_35 = arith.constant dense<0.000000e+00> : vector<1xf32>
    %57 = vector.multi_reduction <add>, %56, %cst_35 [1] : vector<1x8xf32> to vector<1xf32>
    %58 = vector.shape_cast %57 : vector<1xf32> to vector<1x1xf32>
    %59 = tpu.reciprocal %58 {approx = true} : vector<1x1xf32> -> vector<1x1xf32>
    %60 = vector.broadcast %59 : vector<1x1xf32> to vector<1x8xf32>
    %61 = arith.mulf %56, %60 : vector<1x8xf32>
    %c0_36 = arith.constant 0 : index
    %c0_37 = arith.constant 0 : index
    %c0_38 = arith.constant 0 : index
    %62 = vector.load %arg1[%c0_36, %c0_37, %c0_38] : memref<1x8x32xf32, #tpu.memory_space<vmem>>, vector<1x8x32xf32>
    %63 = vector.shape_cast %62 : vector<1x8x32xf32> to vector<8x32xf32>
    %cst_39 = arith.constant dense<0.000000e+00> : vector<1x32xf32>
    %64 = tpu.matmul %61, %63, %cst_39 {dimension_numbers = #tpu.dot_dimension_numbers<[1], [0], [0], [1], [0, 0, 1, 1], [], []>} : vector<1x8xf32>, vector<8x32xf32>, vector<1x32xf32> -> vector<1x32xf32>
    %65 = arith.mulf %64, %64 : vector<1x32xf32>
    %c0_40 = arith.constant 0 : index
    %c0_41 = arith.constant 0 : index
    %66 = vector.load %arg3[%c0_40, %c0_41] : memref<32x2xf32, #tpu.memory_space<vmem>>, vector<32x2xf32>
    %cst_42 = arith.constant dense<0.000000e+00> : vector<1x2xf32>
    %67 = tpu.matmul %65, %66, %cst_42 {dimension_numbers = #tpu.dot_dimension_numbers<[1], [0], [0], [1], [0, 0, 1, 1], [], []>} : vector<1x32xf32>, vector<32x2xf32>, vector<1x2xf32> -> vector<1x2xf32>
    %cst_43 = arith.constant 9.99999996E-13 : f32
    %68 = vector.broadcast %cst_43 : f32 to vector<1x2xf32>
    %69 = arith.addf %67, %68 : vector<1x2xf32>
    %70 = math.sqrt %69 : vector<1x2xf32>
    %cst_44 = arith.constant 1.000000e+00 : f32
    %71 = vector.broadcast %cst_44 : f32 to vector<1x2xf32>
    %72 = arith.addf %71, %67 : vector<1x2xf32>
    %73 = tpu.reciprocal %72 {approx = true} : vector<1x2xf32> -> vector<1x2xf32>
    %74 = arith.mulf %70, %73 : vector<1x2xf32>
    %c0_45 = arith.constant 0 : index
    %c0_46 = arith.constant 0 : index
    %75 = vector.load %arg4[%c0_45, %c0_46] : memref<2x32xf32, #tpu.memory_space<vmem>>, vector<2x32xf32>
    %cst_47 = arith.constant dense<0.000000e+00> : vector<1x32xf32>
    %76 = tpu.matmul %74, %75, %cst_47 {dimension_numbers = #tpu.dot_dimension_numbers<[1], [0], [0], [1], [0, 0, 1, 1], [], []>} : vector<1x2xf32>, vector<2x32xf32>, vector<1x32xf32> -> vector<1x32xf32>
    %77 = arith.mulf %64, %76 : vector<1x32xf32>
    %c0_48 = arith.constant 0 : index
    %c0_49 = arith.constant 0 : index
    %c0_50 = arith.constant 0 : index
    %78 = vector.load %arg2[%c0_48, %c0_49, %c0_50] : memref<1x32x8xf32, #tpu.memory_space<vmem>>, vector<1x32x8xf32>
    %79 = vector.shape_cast %78 : vector<1x32x8xf32> to vector<32x8xf32>
    %cst_51 = arith.constant dense<0.000000e+00> : vector<1x8xf32>
    %80 = tpu.matmul %77, %79, %cst_51 {dimension_numbers = #tpu.dot_dimension_numbers<[1], [0], [0], [1], [0, 0, 1, 1], [], []>} : vector<1x32xf32>, vector<32x8xf32>, vector<1x8xf32> -> vector<1x8xf32>
    %81 = arith.addf %51, %80 : vector<1x8xf32>
    %c2_i32 = arith.constant 2 : i32
    %cst_52 = arith.constant dense<0xFF800000> : vector<1xf32>
    %82 = vector.multi_reduction <maximumf>, %81, %cst_52 [1] : vector<1x8xf32> to vector<1xf32>
    %83 = vector.shape_cast %82 : vector<1xf32> to vector<1x1xf32>
    %84 = vector.broadcast %83 : vector<1x1xf32> to vector<1x8xf32>
    %85 = arith.subf %81, %84 : vector<1x8xf32>
    %86 = math.exp %85 : vector<1x8xf32>
    %cst_53 = arith.constant dense<0.000000e+00> : vector<1xf32>
    %87 = vector.multi_reduction <add>, %86, %cst_53 [1] : vector<1x8xf32> to vector<1xf32>
    %88 = vector.shape_cast %87 : vector<1xf32> to vector<1x1xf32>
    %89 = tpu.reciprocal %88 {approx = true} : vector<1x1xf32> -> vector<1x1xf32>
    %90 = vector.broadcast %89 : vector<1x1xf32> to vector<1x8xf32>
    %91 = arith.mulf %86, %90 : vector<1x8xf32>
    %c0_54 = arith.constant 0 : index
    %c0_55 = arith.constant 0 : index
    %c0_56 = arith.constant 0 : index
    %92 = vector.load %arg1[%c0_54, %c0_55, %c0_56] : memref<1x8x32xf32, #tpu.memory_space<vmem>>, vector<1x8x32xf32>
    %93 = vector.shape_cast %92 : vector<1x8x32xf32> to vector<8x32xf32>
    %cst_57 = arith.constant dense<0.000000e+00> : vector<1x32xf32>
    %94 = tpu.matmul %91, %93, %cst_57 {dimension_numbers = #tpu.dot_dimension_numbers<[1], [0], [0], [1], [0, 0, 1, 1], [], []>} : vector<1x8xf32>, vector<8x32xf32>, vector<1x32xf32> -> vector<1x32xf32>
    %95 = arith.mulf %94, %94 : vector<1x32xf32>
    %c0_58 = arith.constant 0 : index
    %c0_59 = arith.constant 0 : index
    %96 = vector.load %arg3[%c0_58, %c0_59] : memref<32x2xf32, #tpu.memory_space<vmem>>, vector<32x2xf32>
    %cst_60 = arith.constant dense<0.000000e+00> : vector<1x2xf32>
    %97 = tpu.matmul %95, %96, %cst_60 {dimension_numbers = #tpu.dot_dimension_numbers<[1], [0], [0], [1], [0, 0, 1, 1], [], []>} : vector<1x32xf32>, vector<32x2xf32>, vector<1x2xf32> -> vector<1x2xf32>
    %cst_61 = arith.constant 9.99999996E-13 : f32
    %98 = vector.broadcast %cst_61 : f32 to vector<1x2xf32>
    %99 = arith.addf %97, %98 : vector<1x2xf32>
    %100 = math.sqrt %99 : vector<1x2xf32>
    %cst_62 = arith.constant 1.000000e+00 : f32
    %101 = vector.broadcast %cst_62 : f32 to vector<1x2xf32>
    %102 = arith.addf %101, %97 : vector<1x2xf32>
    %103 = tpu.reciprocal %102 {approx = true} : vector<1x2xf32> -> vector<1x2xf32>
    %104 = arith.mulf %100, %103 : vector<1x2xf32>
    %c0_63 = arith.constant 0 : index
    %c0_64 = arith.constant 0 : index
    %105 = vector.load %arg4[%c0_63, %c0_64] : memref<2x32xf32, #tpu.memory_space<vmem>>, vector<2x32xf32>
    %cst_65 = arith.constant dense<0.000000e+00> : vector<1x32xf32>
    %106 = tpu.matmul %104, %105, %cst_65 {dimension_numbers = #tpu.dot_dimension_numbers<[1], [0], [0], [1], [0, 0, 1, 1], [], []>} : vector<1x2xf32>, vector<2x32xf32>, vector<1x32xf32> -> vector<1x32xf32>
    %107 = arith.mulf %94, %106 : vector<1x32xf32>
    %c0_66 = arith.constant 0 : index
    %c0_67 = arith.constant 0 : index
    %c0_68 = arith.constant 0 : index
    %108 = vector.load %arg2[%c0_66, %c0_67, %c0_68] : memref<1x32x8xf32, #tpu.memory_space<vmem>>, vector<1x32x8xf32>
    %109 = vector.shape_cast %108 : vector<1x32x8xf32> to vector<32x8xf32>
    %cst_69 = arith.constant dense<0.000000e+00> : vector<1x8xf32>
    %110 = tpu.matmul %107, %109, %cst_69 {dimension_numbers = #tpu.dot_dimension_numbers<[1], [0], [0], [1], [0, 0, 1, 1], [], []>} : vector<1x32xf32>, vector<32x8xf32>, vector<1x8xf32> -> vector<1x8xf32>
    %111 = arith.addf %81, %110 : vector<1x8xf32>
    %c3_i32 = arith.constant 3 : i32
    %cst_70 = arith.constant dense<0xFF800000> : vector<1xf32>
    %112 = vector.multi_reduction <maximumf>, %111, %cst_70 [1] : vector<1x8xf32> to vector<1xf32>
    %113 = vector.shape_cast %112 : vector<1xf32> to vector<1x1xf32>
    %114 = vector.broadcast %113 : vector<1x1xf32> to vector<1x8xf32>
    %115 = arith.subf %111, %114 : vector<1x8xf32>
    %116 = math.exp %115 : vector<1x8xf32>
    %cst_71 = arith.constant dense<0.000000e+00> : vector<1xf32>
    %117 = vector.multi_reduction <add>, %116, %cst_71 [1] : vector<1x8xf32> to vector<1xf32>
    %118 = vector.shape_cast %117 : vector<1xf32> to vector<1x1xf32>
    %119 = tpu.reciprocal %118 {approx = true} : vector<1x1xf32> -> vector<1x1xf32>
    %120 = vector.broadcast %119 : vector<1x1xf32> to vector<1x8xf32>
    %121 = arith.mulf %116, %120 : vector<1x8xf32>
    %c0_72 = arith.constant 0 : index
    %c0_73 = arith.constant 0 : index
    %c0_74 = arith.constant 0 : index
    %122 = vector.load %arg1[%c0_72, %c0_73, %c0_74] : memref<1x8x32xf32, #tpu.memory_space<vmem>>, vector<1x8x32xf32>
    %123 = vector.shape_cast %122 : vector<1x8x32xf32> to vector<8x32xf32>
    %cst_75 = arith.constant dense<0.000000e+00> : vector<1x32xf32>
    %124 = tpu.matmul %121, %123, %cst_75 {dimension_numbers = #tpu.dot_dimension_numbers<[1], [0], [0], [1], [0, 0, 1, 1], [], []>} : vector<1x8xf32>, vector<8x32xf32>, vector<1x32xf32> -> vector<1x32xf32>
    %125 = arith.mulf %124, %124 : vector<1x32xf32>
    %c0_76 = arith.constant 0 : index
    %c0_77 = arith.constant 0 : index
    %126 = vector.load %arg3[%c0_76, %c0_77] : memref<32x2xf32, #tpu.memory_space<vmem>>, vector<32x2xf32>
    %cst_78 = arith.constant dense<0.000000e+00> : vector<1x2xf32>
    %127 = tpu.matmul %125, %126, %cst_78 {dimension_numbers = #tpu.dot_dimension_numbers<[1], [0], [0], [1], [0, 0, 1, 1], [], []>} : vector<1x32xf32>, vector<32x2xf32>, vector<1x2xf32> -> vector<1x2xf32>
    %cst_79 = arith.constant 9.99999996E-13 : f32
    %128 = vector.broadcast %cst_79 : f32 to vector<1x2xf32>
    %129 = arith.addf %127, %128 : vector<1x2xf32>
    %130 = math.sqrt %129 : vector<1x2xf32>
    %cst_80 = arith.constant 1.000000e+00 : f32
    %131 = vector.broadcast %cst_80 : f32 to vector<1x2xf32>
    %132 = arith.addf %131, %127 : vector<1x2xf32>
    %133 = tpu.reciprocal %132 {approx = true} : vector<1x2xf32> -> vector<1x2xf32>
    %134 = arith.mulf %130, %133 : vector<1x2xf32>
    %c0_81 = arith.constant 0 : index
    %c0_82 = arith.constant 0 : index
    %135 = vector.load %arg4[%c0_81, %c0_82] : memref<2x32xf32, #tpu.memory_space<vmem>>, vector<2x32xf32>
    %cst_83 = arith.constant dense<0.000000e+00> : vector<1x32xf32>
    %136 = tpu.matmul %134, %135, %cst_83 {dimension_numbers = #tpu.dot_dimension_numbers<[1], [0], [0], [1], [0, 0, 1, 1], [], []>} : vector<1x2xf32>, vector<2x32xf32>, vector<1x32xf32> -> vector<1x32xf32>
    %137 = arith.mulf %124, %136 : vector<1x32xf32>
    %c0_84 = arith.constant 0 : index
    %c0_85 = arith.constant 0 : index
    %c0_86 = arith.constant 0 : index
    %138 = vector.load %arg2[%c0_84, %c0_85, %c0_86] : memref<1x32x8xf32, #tpu.memory_space<vmem>>, vector<1x32x8xf32>
    %139 = vector.shape_cast %138 : vector<1x32x8xf32> to vector<32x8xf32>
    %cst_87 = arith.constant dense<0.000000e+00> : vector<1x8xf32>
    %140 = tpu.matmul %137, %139, %cst_87 {dimension_numbers = #tpu.dot_dimension_numbers<[1], [0], [0], [1], [0, 0, 1, 1], [], []>} : vector<1x32xf32>, vector<32x8xf32>, vector<1x8xf32> -> vector<1x8xf32>
    %141 = arith.addf %111, %140 : vector<1x8xf32>
    %c4_i32 = arith.constant 4 : i32
    %cst_88 = arith.constant dense<0xFF800000> : vector<1xf32>
    %142 = vector.multi_reduction <maximumf>, %141, %cst_88 [1] : vector<1x8xf32> to vector<1xf32>
    %143 = vector.shape_cast %142 : vector<1xf32> to vector<1x1xf32>
    %144 = vector.broadcast %143 : vector<1x1xf32> to vector<1x8xf32>
    %145 = arith.subf %141, %144 : vector<1x8xf32>
    %146 = math.exp %145 : vector<1x8xf32>
    %cst_89 = arith.constant dense<0.000000e+00> : vector<1xf32>
    %147 = vector.multi_reduction <add>, %146, %cst_89 [1] : vector<1x8xf32> to vector<1xf32>
    %148 = vector.shape_cast %147 : vector<1xf32> to vector<1x1xf32>
    %149 = tpu.reciprocal %148 {approx = true} : vector<1x1xf32> -> vector<1x1xf32>
    %150 = vector.broadcast %149 : vector<1x1xf32> to vector<1x8xf32>
    %151 = arith.mulf %146, %150 : vector<1x8xf32>
    %c0_90 = arith.constant 0 : index
    %c0_91 = arith.constant 0 : index
    %c0_92 = arith.constant 0 : index
    %152 = vector.load %arg1[%c0_90, %c0_91, %c0_92] : memref<1x8x32xf32, #tpu.memory_space<vmem>>, vector<1x8x32xf32>
    %153 = vector.shape_cast %152 : vector<1x8x32xf32> to vector<8x32xf32>
    %cst_93 = arith.constant dense<0.000000e+00> : vector<1x32xf32>
    %154 = tpu.matmul %151, %153, %cst_93 {dimension_numbers = #tpu.dot_dimension_numbers<[1], [0], [0], [1], [0, 0, 1, 1], [], []>} : vector<1x8xf32>, vector<8x32xf32>, vector<1x32xf32> -> vector<1x32xf32>
    %155 = arith.mulf %154, %154 : vector<1x32xf32>
    %c0_94 = arith.constant 0 : index
    %c0_95 = arith.constant 0 : index
    %156 = vector.load %arg3[%c0_94, %c0_95] : memref<32x2xf32, #tpu.memory_space<vmem>>, vector<32x2xf32>
    %cst_96 = arith.constant dense<0.000000e+00> : vector<1x2xf32>
    %157 = tpu.matmul %155, %156, %cst_96 {dimension_numbers = #tpu.dot_dimension_numbers<[1], [0], [0], [1], [0, 0, 1, 1], [], []>} : vector<1x32xf32>, vector<32x2xf32>, vector<1x2xf32> -> vector<1x2xf32>
    %cst_97 = arith.constant 9.99999996E-13 : f32
    %158 = vector.broadcast %cst_97 : f32 to vector<1x2xf32>
    %159 = arith.addf %157, %158 : vector<1x2xf32>
    %160 = math.sqrt %159 : vector<1x2xf32>
    %cst_98 = arith.constant 1.000000e+00 : f32
    %161 = vector.broadcast %cst_98 : f32 to vector<1x2xf32>
    %162 = arith.addf %161, %157 : vector<1x2xf32>
    %163 = tpu.reciprocal %162 {approx = true} : vector<1x2xf32> -> vector<1x2xf32>
    %164 = arith.mulf %160, %163 : vector<1x2xf32>
    %c0_99 = arith.constant 0 : index
    %c0_100 = arith.constant 0 : index
    %165 = vector.load %arg4[%c0_99, %c0_100] : memref<2x32xf32, #tpu.memory_space<vmem>>, vector<2x32xf32>
    %cst_101 = arith.constant dense<0.000000e+00> : vector<1x32xf32>
    %166 = tpu.matmul %164, %165, %cst_101 {dimension_numbers = #tpu.dot_dimension_numbers<[1], [0], [0], [1], [0, 0, 1, 1], [], []>} : vector<1x2xf32>, vector<2x32xf32>, vector<1x32xf32> -> vector<1x32xf32>
    %167 = arith.mulf %154, %166 : vector<1x32xf32>
    %c0_102 = arith.constant 0 : index
    %c0_103 = arith.constant 0 : index
    %c0_104 = arith.constant 0 : index
    %168 = vector.load %arg2[%c0_102, %c0_103, %c0_104] : memref<1x32x8xf32, #tpu.memory_space<vmem>>, vector<1x32x8xf32>
    %169 = vector.shape_cast %168 : vector<1x32x8xf32> to vector<32x8xf32>
    %cst_105 = arith.constant dense<0.000000e+00> : vector<1x8xf32>
    %170 = tpu.matmul %167, %169, %cst_105 {dimension_numbers = #tpu.dot_dimension_numbers<[1], [0], [0], [1], [0, 0, 1, 1], [], []>} : vector<1x32xf32>, vector<32x8xf32>, vector<1x8xf32> -> vector<1x8xf32>
    %171 = arith.addf %141, %170 : vector<1x8xf32>
    %c5_i32 = arith.constant 5 : i32
    %cst_106 = arith.constant dense<0xFF800000> : vector<1xf32>
    %172 = vector.multi_reduction <maximumf>, %171, %cst_106 [1] : vector<1x8xf32> to vector<1xf32>
    %173 = vector.shape_cast %172 : vector<1xf32> to vector<1x1xf32>
    %174 = vector.broadcast %173 : vector<1x1xf32> to vector<1x8xf32>
    %175 = arith.subf %171, %174 : vector<1x8xf32>
    %176 = math.exp %175 : vector<1x8xf32>
    %cst_107 = arith.constant dense<0.000000e+00> : vector<1xf32>
    %177 = vector.multi_reduction <add>, %176, %cst_107 [1] : vector<1x8xf32> to vector<1xf32>
    %178 = vector.shape_cast %177 : vector<1xf32> to vector<1x1xf32>
    %179 = tpu.reciprocal %178 {approx = true} : vector<1x1xf32> -> vector<1x1xf32>
    %180 = vector.broadcast %179 : vector<1x1xf32> to vector<1x8xf32>
    %181 = arith.mulf %176, %180 : vector<1x8xf32>
    %c0_108 = arith.constant 0 : index
    %c0_109 = arith.constant 0 : index
    %c0_110 = arith.constant 0 : index
    %182 = vector.load %arg1[%c0_108, %c0_109, %c0_110] : memref<1x8x32xf32, #tpu.memory_space<vmem>>, vector<1x8x32xf32>
    %183 = vector.shape_cast %182 : vector<1x8x32xf32> to vector<8x32xf32>
    %cst_111 = arith.constant dense<0.000000e+00> : vector<1x32xf32>
    %184 = tpu.matmul %181, %183, %cst_111 {dimension_numbers = #tpu.dot_dimension_numbers<[1], [0], [0], [1], [0, 0, 1, 1], [], []>} : vector<1x8xf32>, vector<8x32xf32>, vector<1x32xf32> -> vector<1x32xf32>
    %185 = arith.mulf %184, %184 : vector<1x32xf32>
    %c0_112 = arith.constant 0 : index
    %c0_113 = arith.constant 0 : index
    %186 = vector.load %arg3[%c0_112, %c0_113] : memref<32x2xf32, #tpu.memory_space<vmem>>, vector<32x2xf32>
    %cst_114 = arith.constant dense<0.000000e+00> : vector<1x2xf32>
    %187 = tpu.matmul %185, %186, %cst_114 {dimension_numbers = #tpu.dot_dimension_numbers<[1], [0], [0], [1], [0, 0, 1, 1], [], []>} : vector<1x32xf32>, vector<32x2xf32>, vector<1x2xf32> -> vector<1x2xf32>
    %cst_115 = arith.constant 9.99999996E-13 : f32
    %188 = vector.broadcast %cst_115 : f32 to vector<1x2xf32>
    %189 = arith.addf %187, %188 : vector<1x2xf32>
    %190 = math.sqrt %189 : vector<1x2xf32>
    %cst_116 = arith.constant 1.000000e+00 : f32
    %191 = vector.broadcast %cst_116 : f32 to vector<1x2xf32>
    %192 = arith.addf %191, %187 : vector<1x2xf32>
    %193 = tpu.reciprocal %192 {approx = true} : vector<1x2xf32> -> vector<1x2xf32>
    %194 = arith.mulf %190, %193 : vector<1x2xf32>
    %c0_117 = arith.constant 0 : index
    %c0_118 = arith.constant 0 : index
    %195 = vector.load %arg4[%c0_117, %c0_118] : memref<2x32xf32, #tpu.memory_space<vmem>>, vector<2x32xf32>
    %cst_119 = arith.constant dense<0.000000e+00> : vector<1x32xf32>
    %196 = tpu.matmul %194, %195, %cst_119 {dimension_numbers = #tpu.dot_dimension_numbers<[1], [0], [0], [1], [0, 0, 1, 1], [], []>} : vector<1x2xf32>, vector<2x32xf32>, vector<1x32xf32> -> vector<1x32xf32>
    %197 = arith.mulf %184, %196 : vector<1x32xf32>
    %c0_120 = arith.constant 0 : index
    %c0_121 = arith.constant 0 : index
    %c0_122 = arith.constant 0 : index
    %198 = vector.load %arg2[%c0_120, %c0_121, %c0_122] : memref<1x32x8xf32, #tpu.memory_space<vmem>>, vector<1x32x8xf32>
    %199 = vector.shape_cast %198 : vector<1x32x8xf32> to vector<32x8xf32>
    %cst_123 = arith.constant dense<0.000000e+00> : vector<1x8xf32>
    %200 = tpu.matmul %197, %199, %cst_123 {dimension_numbers = #tpu.dot_dimension_numbers<[1], [0], [0], [1], [0, 0, 1, 1], [], []>} : vector<1x32xf32>, vector<32x8xf32>, vector<1x8xf32> -> vector<1x8xf32>
    %201 = arith.addf %171, %200 : vector<1x8xf32>
    %c6_i32 = arith.constant 6 : i32
    %cst_124 = arith.constant dense<0xFF800000> : vector<1xf32>
    %202 = vector.multi_reduction <maximumf>, %201, %cst_124 [1] : vector<1x8xf32> to vector<1xf32>
    %203 = vector.shape_cast %202 : vector<1xf32> to vector<1x1xf32>
    %204 = vector.broadcast %203 : vector<1x1xf32> to vector<1x8xf32>
    %205 = arith.subf %201, %204 : vector<1x8xf32>
    %206 = math.exp %205 : vector<1x8xf32>
    %cst_125 = arith.constant dense<0.000000e+00> : vector<1xf32>
    %207 = vector.multi_reduction <add>, %206, %cst_125 [1] : vector<1x8xf32> to vector<1xf32>
    %208 = vector.shape_cast %207 : vector<1xf32> to vector<1x1xf32>
    %209 = tpu.reciprocal %208 {approx = true} : vector<1x1xf32> -> vector<1x1xf32>
    %210 = vector.broadcast %209 : vector<1x1xf32> to vector<1x8xf32>
    %211 = arith.mulf %206, %210 : vector<1x8xf32>
    %c0_126 = arith.constant 0 : index
    %c0_127 = arith.constant 0 : index
    %c0_128 = arith.constant 0 : index
    %212 = vector.load %arg1[%c0_126, %c0_127, %c0_128] : memref<1x8x32xf32, #tpu.memory_space<vmem>>, vector<1x8x32xf32>
    %213 = vector.shape_cast %212 : vector<1x8x32xf32> to vector<8x32xf32>
    %cst_129 = arith.constant dense<0.000000e+00> : vector<1x32xf32>
    %214 = tpu.matmul %211, %213, %cst_129 {dimension_numbers = #tpu.dot_dimension_numbers<[1], [0], [0], [1], [0, 0, 1, 1], [], []>} : vector<1x8xf32>, vector<8x32xf32>, vector<1x32xf32> -> vector<1x32xf32>
    %215 = arith.mulf %214, %214 : vector<1x32xf32>
    %c0_130 = arith.constant 0 : index
    %c0_131 = arith.constant 0 : index
    %216 = vector.load %arg3[%c0_130, %c0_131] : memref<32x2xf32, #tpu.memory_space<vmem>>, vector<32x2xf32>
    %cst_132 = arith.constant dense<0.000000e+00> : vector<1x2xf32>
    %217 = tpu.matmul %215, %216, %cst_132 {dimension_numbers = #tpu.dot_dimension_numbers<[1], [0], [0], [1], [0, 0, 1, 1], [], []>} : vector<1x32xf32>, vector<32x2xf32>, vector<1x2xf32> -> vector<1x2xf32>
    %cst_133 = arith.constant 9.99999996E-13 : f32
    %218 = vector.broadcast %cst_133 : f32 to vector<1x2xf32>
    %219 = arith.addf %217, %218 : vector<1x2xf32>
    %220 = math.sqrt %219 : vector<1x2xf32>
    %cst_134 = arith.constant 1.000000e+00 : f32
    %221 = vector.broadcast %cst_134 : f32 to vector<1x2xf32>
    %222 = arith.addf %221, %217 : vector<1x2xf32>
    %223 = tpu.reciprocal %222 {approx = true} : vector<1x2xf32> -> vector<1x2xf32>
    %224 = arith.mulf %220, %223 : vector<1x2xf32>
    %c0_135 = arith.constant 0 : index
    %c0_136 = arith.constant 0 : index
    %225 = vector.load %arg4[%c0_135, %c0_136] : memref<2x32xf32, #tpu.memory_space<vmem>>, vector<2x32xf32>
    %cst_137 = arith.constant dense<0.000000e+00> : vector<1x32xf32>
    %226 = tpu.matmul %224, %225, %cst_137 {dimension_numbers = #tpu.dot_dimension_numbers<[1], [0], [0], [1], [0, 0, 1, 1], [], []>} : vector<1x2xf32>, vector<2x32xf32>, vector<1x32xf32> -> vector<1x32xf32>
    %227 = arith.mulf %214, %226 : vector<1x32xf32>
    %c0_138 = arith.constant 0 : index
    %c0_139 = arith.constant 0 : index
    %c0_140 = arith.constant 0 : index
    %228 = vector.load %arg2[%c0_138, %c0_139, %c0_140] : memref<1x32x8xf32, #tpu.memory_space<vmem>>, vector<1x32x8xf32>
    %229 = vector.shape_cast %228 : vector<1x32x8xf32> to vector<32x8xf32>
    %cst_141 = arith.constant dense<0.000000e+00> : vector<1x8xf32>
    %230 = tpu.matmul %227, %229, %cst_141 {dimension_numbers = #tpu.dot_dimension_numbers<[1], [0], [0], [1], [0, 0, 1, 1], [], []>} : vector<1x32xf32>, vector<32x8xf32>, vector<1x8xf32> -> vector<1x8xf32>
    %231 = arith.addf %201, %230 : vector<1x8xf32>
    %c7_i32 = arith.constant 7 : i32
    %cst_142 = arith.constant dense<0xFF800000> : vector<1xf32>
    %232 = vector.multi_reduction <maximumf>, %231, %cst_142 [1] : vector<1x8xf32> to vector<1xf32>
    %233 = vector.shape_cast %232 : vector<1xf32> to vector<1x1xf32>
    %234 = vector.broadcast %233 : vector<1x1xf32> to vector<1x8xf32>
    %235 = arith.subf %231, %234 : vector<1x8xf32>
    %236 = math.exp %235 : vector<1x8xf32>
    %cst_143 = arith.constant dense<0.000000e+00> : vector<1xf32>
    %237 = vector.multi_reduction <add>, %236, %cst_143 [1] : vector<1x8xf32> to vector<1xf32>
    %238 = vector.shape_cast %237 : vector<1xf32> to vector<1x1xf32>
    %239 = tpu.reciprocal %238 {approx = true} : vector<1x1xf32> -> vector<1x1xf32>
    %240 = vector.broadcast %239 : vector<1x1xf32> to vector<1x8xf32>
    %241 = arith.mulf %236, %240 : vector<1x8xf32>
    %c0_144 = arith.constant 0 : index
    %c0_145 = arith.constant 0 : index
    %c0_146 = arith.constant 0 : index
    %242 = vector.load %arg1[%c0_144, %c0_145, %c0_146] : memref<1x8x32xf32, #tpu.memory_space<vmem>>, vector<1x8x32xf32>
    %243 = vector.shape_cast %242 : vector<1x8x32xf32> to vector<8x32xf32>
    %cst_147 = arith.constant dense<0.000000e+00> : vector<1x32xf32>
    %244 = tpu.matmul %241, %243, %cst_147 {dimension_numbers = #tpu.dot_dimension_numbers<[1], [0], [0], [1], [0, 0, 1, 1], [], []>} : vector<1x8xf32>, vector<8x32xf32>, vector<1x32xf32> -> vector<1x32xf32>
    %245 = arith.mulf %244, %244 : vector<1x32xf32>
    %c0_148 = arith.constant 0 : index
    %c0_149 = arith.constant 0 : index
    %246 = vector.load %arg3[%c0_148, %c0_149] : memref<32x2xf32, #tpu.memory_space<vmem>>, vector<32x2xf32>
    %cst_150 = arith.constant dense<0.000000e+00> : vector<1x2xf32>
    %247 = tpu.matmul %245, %246, %cst_150 {dimension_numbers = #tpu.dot_dimension_numbers<[1], [0], [0], [1], [0, 0, 1, 1], [], []>} : vector<1x32xf32>, vector<32x2xf32>, vector<1x2xf32> -> vector<1x2xf32>
    %cst_151 = arith.constant 9.99999996E-13 : f32
    %248 = vector.broadcast %cst_151 : f32 to vector<1x2xf32>
    %249 = arith.addf %247, %248 : vector<1x2xf32>
    %250 = math.sqrt %249 : vector<1x2xf32>
    %cst_152 = arith.constant 1.000000e+00 : f32
    %251 = vector.broadcast %cst_152 : f32 to vector<1x2xf32>
    %252 = arith.addf %251, %247 : vector<1x2xf32>
    %253 = tpu.reciprocal %252 {approx = true} : vector<1x2xf32> -> vector<1x2xf32>
    %254 = arith.mulf %250, %253 : vector<1x2xf32>
    %c0_153 = arith.constant 0 : index
    %c0_154 = arith.constant 0 : index
    %255 = vector.load %arg4[%c0_153, %c0_154] : memref<2x32xf32, #tpu.memory_space<vmem>>, vector<2x32xf32>
    %cst_155 = arith.constant dense<0.000000e+00> : vector<1x32xf32>
    %256 = tpu.matmul %254, %255, %cst_155 {dimension_numbers = #tpu.dot_dimension_numbers<[1], [0], [0], [1], [0, 0, 1, 1], [], []>} : vector<1x2xf32>, vector<2x32xf32>, vector<1x32xf32> -> vector<1x32xf32>
    %257 = arith.mulf %244, %256 : vector<1x32xf32>
    %c0_156 = arith.constant 0 : index
    %c0_157 = arith.constant 0 : index
    %c0_158 = arith.constant 0 : index
    %258 = vector.load %arg2[%c0_156, %c0_157, %c0_158] : memref<1x32x8xf32, #tpu.memory_space<vmem>>, vector<1x32x8xf32>
    %259 = vector.shape_cast %258 : vector<1x32x8xf32> to vector<32x8xf32>
    %cst_159 = arith.constant dense<0.000000e+00> : vector<1x8xf32>
    %260 = tpu.matmul %257, %259, %cst_159 {dimension_numbers = #tpu.dot_dimension_numbers<[1], [0], [0], [1], [0, 0, 1, 1], [], []>} : vector<1x32xf32>, vector<32x8xf32>, vector<1x8xf32> -> vector<1x8xf32>
    %261 = arith.addf %231, %260 : vector<1x8xf32>
    %c8_i32 = arith.constant 8 : i32
    %cst_160 = arith.constant dense<0xFF800000> : vector<1xf32>
    %262 = vector.multi_reduction <maximumf>, %261, %cst_160 [1] : vector<1x8xf32> to vector<1xf32>
    %263 = vector.shape_cast %262 : vector<1xf32> to vector<1x1xf32>
    %264 = vector.broadcast %263 : vector<1x1xf32> to vector<1x8xf32>
    %265 = arith.subf %261, %264 : vector<1x8xf32>
    %266 = math.exp %265 : vector<1x8xf32>
    %cst_161 = arith.constant dense<0.000000e+00> : vector<1xf32>
    %267 = vector.multi_reduction <add>, %266, %cst_161 [1] : vector<1x8xf32> to vector<1xf32>
    %268 = vector.shape_cast %267 : vector<1xf32> to vector<1x1xf32>
    %269 = tpu.reciprocal %268 {approx = true} : vector<1x1xf32> -> vector<1x1xf32>
    %270 = vector.broadcast %269 : vector<1x1xf32> to vector<1x8xf32>
    %271 = arith.mulf %266, %270 : vector<1x8xf32>
    %c0_162 = arith.constant 0 : index
    %c0_163 = arith.constant 0 : index
    %c0_164 = arith.constant 0 : index
    %272 = vector.load %arg1[%c0_162, %c0_163, %c0_164] : memref<1x8x32xf32, #tpu.memory_space<vmem>>, vector<1x8x32xf32>
    %273 = vector.shape_cast %272 : vector<1x8x32xf32> to vector<8x32xf32>
    %cst_165 = arith.constant dense<0.000000e+00> : vector<1x32xf32>
    %274 = tpu.matmul %271, %273, %cst_165 {dimension_numbers = #tpu.dot_dimension_numbers<[1], [0], [0], [1], [0, 0, 1, 1], [], []>} : vector<1x8xf32>, vector<8x32xf32>, vector<1x32xf32> -> vector<1x32xf32>
    %275 = arith.mulf %274, %274 : vector<1x32xf32>
    %c0_166 = arith.constant 0 : index
    %c0_167 = arith.constant 0 : index
    %276 = vector.load %arg3[%c0_166, %c0_167] : memref<32x2xf32, #tpu.memory_space<vmem>>, vector<32x2xf32>
    %cst_168 = arith.constant dense<0.000000e+00> : vector<1x2xf32>
    %277 = tpu.matmul %275, %276, %cst_168 {dimension_numbers = #tpu.dot_dimension_numbers<[1], [0], [0], [1], [0, 0, 1, 1], [], []>} : vector<1x32xf32>, vector<32x2xf32>, vector<1x2xf32> -> vector<1x2xf32>
    %cst_169 = arith.constant 9.99999996E-13 : f32
    %278 = vector.broadcast %cst_169 : f32 to vector<1x2xf32>
    %279 = arith.addf %277, %278 : vector<1x2xf32>
    %280 = math.sqrt %279 : vector<1x2xf32>
    %cst_170 = arith.constant 1.000000e+00 : f32
    %281 = vector.broadcast %cst_170 : f32 to vector<1x2xf32>
    %282 = arith.addf %281, %277 : vector<1x2xf32>
    %283 = tpu.reciprocal %282 {approx = true} : vector<1x2xf32> -> vector<1x2xf32>
    %284 = arith.mulf %280, %283 : vector<1x2xf32>
    %c0_171 = arith.constant 0 : index
    %c0_172 = arith.constant 0 : index
    %285 = vector.load %arg4[%c0_171, %c0_172] : memref<2x32xf32, #tpu.memory_space<vmem>>, vector<2x32xf32>
    %cst_173 = arith.constant dense<0.000000e+00> : vector<1x32xf32>
    %286 = tpu.matmul %284, %285, %cst_173 {dimension_numbers = #tpu.dot_dimension_numbers<[1], [0], [0], [1], [0, 0, 1, 1], [], []>} : vector<1x2xf32>, vector<2x32xf32>, vector<1x32xf32> -> vector<1x32xf32>
    %287 = arith.mulf %274, %286 : vector<1x32xf32>
    %c0_174 = arith.constant 0 : index
    %c0_175 = arith.constant 0 : index
    %c0_176 = arith.constant 0 : index
    %288 = vector.load %arg2[%c0_174, %c0_175, %c0_176] : memref<1x32x8xf32, #tpu.memory_space<vmem>>, vector<1x32x8xf32>
    %289 = vector.shape_cast %288 : vector<1x32x8xf32> to vector<32x8xf32>
    %cst_177 = arith.constant dense<0.000000e+00> : vector<1x8xf32>
    %290 = tpu.matmul %287, %289, %cst_177 {dimension_numbers = #tpu.dot_dimension_numbers<[1], [0], [0], [1], [0, 0, 1, 1], [], []>} : vector<1x32xf32>, vector<32x8xf32>, vector<1x8xf32> -> vector<1x8xf32>
    %291 = arith.addf %261, %290 : vector<1x8xf32>
    %c0_178 = arith.constant 0 : index
    %c0_179 = arith.constant 0 : index
    %c0_180 = arith.constant 0 : index
    %292 = vector.load %arg5[%c0_178, %c0_179, %c0_180] : memref<1x1x32xf32, #tpu.memory_space<vmem>>, vector<1x1x32xf32>
    %293 = vector.shape_cast %292 : vector<1x1x32xf32> to vector<1x32xf32>
    %294 = vector.shape_cast %287 : vector<1x32xf32> to vector<1x1x32xf32>
    tpu.vector_store %arg5[%c0_178, %c0_179, %c0_180], %294 {strides = array<i32>} : memref<1x1x32xf32, #tpu.memory_space<vmem>>, vector<1x1x32xf32>,
    return
  }
  func.func @transform_0(%arg0: i32) -> (i32, i32, i32) {
    %c0_i32 = arith.constant 0 : i32
    %c0_i32_0 = arith.constant 0 : i32
    %c0_i32_1 = arith.constant 0 : i32
    return %arg0, %c0_i32, %c0_i32_0 : i32, i32, i32
  }
  func.func @transform_1(%arg0: i32) -> (i32, i32, i32) {
    %c0_i32 = arith.constant 0 : i32
    %c0_i32_0 = arith.constant 0 : i32
    %c0_i32_1 = arith.constant 0 : i32
    return %arg0, %c0_i32, %c0_i32_0 : i32, i32, i32
  }
  func.func @transform_2(%arg0: i32) -> (i32, i32) {
    %c0_i32 = arith.constant 0 : i32
    %c0_i32_0 = arith.constant 0 : i32
    %c0_i32_1 = arith.constant 0 : i32
    return %c0_i32, %c0_i32_0 : i32, i32
  }
  func.func @transform_3(%arg0: i32) -> (i32, i32) {
    %c0_i32 = arith.constant 0 : i32
    %c0_i32_0 = arith.constant 0 : i32
    %c0_i32_1 = arith.constant 0 : i32
    return %c0_i32, %c0_i32_0 : i32, i32
  }
  func.func @transform_4(%arg0: i32) -> (i32, i32, i32) {
    %c0_i32 = arith.constant 0 : i32
    %c0_i32_0 = arith.constant 0 : i32
    %c0_i32_1 = arith.constant 0 : i32
    return %arg0, %c0_i32, %c0_i32_0 : i32, i32, i32
  }
}

</mosaic_0001>

<bundles_post_ra>
// kernel: tpu_custom_call.1
= control target key start
LH: loop header
LB: loop body
LE: loop exit
PB: predicated region body
PF: predicated region fallthrough
CT: control target
= control target key end

     0   :  { %9 = vsyncpa [#allocation3], 0  ;;  %s4622_s0 = inlined_call_operand.vmem [shape: f32[3,8,32], index: 0, kind: input, shape index: {}]   ;;  %s4623_s1 = inlined_call_operand.vmem [shape: f32[3,32,8], index: 1, kind: input, shape index: {}]   ;;  %s4624_s2 = inlined_call_operand.vmem [shape: f32[32,2], index: 2, kind: input, shape index: {}]   ;;  %s4625_s3 = inlined_call_operand.vmem [shape: f32[2,32], index: 3, kind: input, shape index: {}]   ;;  %s4626_s4 = inlined_call_operand.hbm [shape: f32[3,1,32], index: 4, kind: output, shape index: {}]  }
   0x1   :  { %11 = vsyncpa [#allocation3 + $0x1], 0  ;;  %s4227_s15 = smov 0   ;;  %s4229_s16 = smov 0  }
   0x2   :  { %s4231_s17 = smov 0   ;;  %s4233_s18 = smov 0  }
   0x3 LB: > { %s4248_s19 = sadd.s32 4294967295, %s4195_s18   ;;  %s3396_s20 = sadd.s32 4294967294, %s4195_s18   ;;  %s4195_s18 = sphi %s4233_s18, %s4632_s18   ;;  %s4191_s17 = sphi %s4231_s17, %s4631_s17   ;;  %s4187_s16 = sphi %s4229_s16, %s4630_s16   ;;  %s4183_s15 = sphi %s4227_s15, %s4629_s15  }
   0x4   : > { %s4252_s21 = sadd.s32 1, %s4195_s18   ;;  %s118_s22 = sadd.s32 1, %s4191_s17 }
   0x5   : > { %s115_s23 = ssub.s32 %s4195_s18, %s4252_s21  ;;  %p128_p0 = scmp.ne.s32.totalorder %s4191_s17, %s4187_s16 }
   0x6   : > { %p116_p1 = scmp.eq.s32.totalorder %s115_s23, 0  ;;  %p129_p2 = scmp.eq.s32.totalorder %s4248_s19, 2 }
   0x7   : > { %p134_p3 = scmp.ne.s32.totalorder %s4187_s16, %s4183_s15  ;;  %p135_p4 = scmp.eq.s32.totalorder %s3396_s20, 2 }
   0x8   : > { %s4263_s24 = scalar_select %p116_p1, %s4191_s17, %s118_s22  }
   0x9   : > { %p4265_p5 = por %p129_p2, %p128_p0  ;;  %p4269_p6 = por %p135_p4, %p134_p3 }
   0xa   : > { %p3399_p7 = scmp.ge.s32.totalorder %s4195_s18, 1  ;;  %p174_p8 = scmp.lt.s32.totalorder %s4195_s18, 4 }
   0xc   : > { %p175_p9 = pnand %p3399_p7, %p174_p8 }
   0xd   : > { %p203_p10 = scmp.lt.s32.totalorder (!%p175_p9), %s4248_s19, 2  ;;  %v288_v0 = vld [vmem:[%s4624_s2] sm:$0xff] (!%p175_p9)  ;;  %v4197_v1 = vmov (!%p175_p9), 0.0   ;;  %vm4198_vm0 = vmmov (!%p175_p9), 0   ;;  %v289_v2 = vld [vmem:[%s4624_s2 + $0x8] sm:$0xff] (!%p175_p9)  ;;  %v4199_v3 = vmov (!%p175_p9), 0.0|0.0  }
   0xe   : > { %178 = sbr.rel (%p175_p9) target bundleno = 11383 (0x2c77), region = 36  ;;  %3591 = vmatprep.subr.mxu0 (!%p175_p9), %v4197_v1  ;;  %3593 = vmatprep.mubr.msk.f32.mxu0 (!%p175_p9), %vm4198_vm0, %v4197_v1  ;;  %v4289_v4 = vpack.c.bf16 (!%p175_p9), %v289_v2, %v288_v0  ;;  %vm213_vm1 = vcmask (!%p175_p9), 64512   ;;  %v4200_v6 = vmov (!%p175_p9), 0.125   ;;  %v290_v7 = vld [vmem:[%s4624_s2 + $0x10] sm:$0xff] (!%p175_p9)  ;;  %v291_v8 = vld [vmem:[%s4624_s2 + $0x18] sm:$0xff] (!%p175_p9)  ;;  %vm292_vm2 = vcmask (!%p175_p9), 261120  }
   0xf   : > { %3900 = vmatprep.subr.bf16.mxu1 (!%p175_p9), %v4199_v3  ;;  %3604 = vmatprep.mubr.msk.f32.mxu1 (!%p175_p9), %vm4198_vm0, %v4197_v1  ;;  %v4312_v9 = vpack.c.bf16 (!%p175_p9), %v291_v8, %v290_v7  ;;  %v4324_v13 = vld [vmem:[%s4625_s3] sm:$0x3] (!%p175_p9)  ;;  %vm382_vm3 = vcmask (!%p175_p9), 1041408   ;;  %vm378_vm6 = vcmask (!%p175_p9), 15360   ;;  %vm534_vm7 = vcmask (!%p175_p9), 57344   ;;  %s201_s29 = sand.u32 (!%p175_p9), 1, %s4187_s16  }
  0x10   : > { %3902 = vmatpush3.bf16.msra.mxu1 (!%p175_p9), %v4289_v4  ;;  %s3452_s30 = sshll.u32 (!%p175_p9), %s4248_s19, 4  ;;  %s3317_s10 = scalar_lea.sflag (!%p175_p9), [#allocation3], %s201_s29 }
  0x11   : > { %3903 = vmatprep.subr.bf16.mxu1 (!%p175_p9), %v4199_v3 }
  0x14   : > { %3905 = vmatpush3.bf16.msra.mxu1 (!%p175_p9), %v4312_v9 }
  0x15   : > { %s4286_s5 = scalar_select %p203_p10, %s4248_s19, 2  ;;  %3623 = vmatprep.subr.mxu1 %v4197_v1 }
  0x16   : > { %s4201_s19 = smov [#allocation2]  }
  0x17   : > { %s3400_s6 = sshll.u32 %s4286_s5, 3  ;;  %s3455_s22 = sshll.u32 %s4286_s5, 5 }
  0x18   : > { %s206_s9 = scalar_lea.vmem %s4622_s0, %s3400_s6  ;;  %s211_s28 = scalar_lea.vmem %s4623_s1, %s3455_s22 }
  0x19   : > { %v4299_v5 = vld [vmem:[%s206_s9] sm:$0xff]  ;;  %v458_v20 = vld [vmem:[%s211_s28 + $0x8] sm:$0xff]  ;;  %v459_v27 = vld [vmem:[%s211_s28 + $0x10] sm:$0xff]  ;;  %s202_s5 = scalar_lea.vmem [#allocation2], %s201_s29  ;;  %s4580_s9 = scalar_lea.hbm %s4626_s4, %s3452_s30 }
  0x1a   : > { %3592 = vmatpush3.msra.mxu0 %v4299_v5  ;;  %v457_v19 = vld [vmem:[%s211_s28] sm:$0xff]  ;;  %v460_v28 = vld [vmem:[%s211_s28 + $0x18] sm:$0xff]  ;;  %s3329_s6 = sshll.u32 %s202_s5, 4  ;;  %s4137_s12 = sshll.u32 %s4201_s19, 4  ;;  %s4582_s6 = int_to_ptr.vmem [resolvable:$true] %s3329_s6  ;;  %s4138_s12 = int_to_ptr.vmem [resolvable:$false] %s4137_s12 }
  0x1b   : > { %3594 = vmatmul.mubr.msk.f32.vlgmr.msra.gmra.mrb[0].mxu0 %vm213_vm1, %v4200_v6  ;;  %3607 = vmatprep.subr.mxu0 %v4197_v1  ;;  %v4333_v25 = vpack.c.bf16 %v458_v20, %v457_v19  ;;  %v4336_v30 = vpack.c.bf16 %v460_v28, %v459_v27  ;;  %s4133_s11 = scalar_lea.vmem %s4582_s6, 16  ;;  %s4139_s13 = scalar_lea.vmem %s4138_s12, 32 }
  0x1c   : > { %3609 = vmatprep.mubr.msk.f32.mxu0 %vm4198_vm0, %v4197_v1  ;;  %3608 = vmatpush3.msk.msra.mxu0 %vm382_vm3, %v4324_v13  ;;  %p4134_p11 = scmp.ne.s32.totalorder %s4582_s6, %s4133_s11  ;;  %p4140_p0 = scmp.lt.s32.totalorder %s4582_s6, %s4138_s12 }
  0x1d   : > { %3906 = vmatprep.subr.bf16.mxu0 %v4199_v3  ;;  %p4141_p1 = scmp.lt.s32.totalorder %s4139_s13, %s4133_s11 }
  0x1e   : > { %p4135_p12 = pnand %p4134_p11, %p4265_p5 }
  0x1f   : > { %p4142_p2 = por %p4141_p1, %p4140_p0 }
  0x20   : > { %p4136_p13 = pneg %p4135_p12 }
  0x22   : > { %p4143_p3 = pnand %p4142_p2, %p4136_p13 }
  0xee   : > { %v283_v10 = vpop.f32.mrb[0].mxu0 }
  0xef   : > { %v287_v11 = vmul.f32 %v283_v10, %v283_v10  ;;  %v3595_v12 = vpop.f32.mrb[1].mxu0 }
  0xf1   : > { %3605 = vmatmul.mubr.msk.f32.vlgmr.msra.gmra.mrb[0].mxu1 %vm292_vm2, %v287_v11 }
  0xf2   : > { %3624 = vmatpush3.msra.mxu1 %v4299_v5  ;;  %3625 = vmatprep.mubr.msk.f32.mxu1 %vm4198_vm0, %v4197_v1 }
  0xf3   : > { %3912 = vmatprep.subr.bf16.mxu1 %v4199_v3 }
 0x1c4   : > { %v362_v14 = vpop.f32.mrb[0].mxu1 }
 0x1c5   : > { %v366_v15 = vadd.f32 1e-12, %v362_v14  ;;  %v3606_v16 = vpop.f32.mrb[1].mxu1  ;;  %v374_v17 = vadd.f32 1.0, %v362_v14 }
 0x1c7   : > { %4057 = vrsqrt.f32 %v366_v15  ;;  %vm369_vm4 = vcmp.eq.f32.partialorder %v366_v15, inf  ;;  %v372_v22 = vand.u32 2147483648, %v366_v15  ;;  %vm371_vm5 = vcmp.eq.f32.partialorder %v366_v15, 0.0 }
 0x1c8   : > { %4059 = vrcp.f32 %v374_v17 }
 0x1d1   : > { %v4058_v18 = vpop.eup %4057 }
 0x1d2   : > { %v368_v21 = vmul.f32 %v4058_v18, %v366_v15  ;;  %v4060_v24 = vpop.eup %4059 }
 0x1d4   : > { %v370_v23 = vsel %vm369_vm4, %v366_v15, %v368_v21 }
 0x1d5   : > { %v373_v26 = vsel %vm371_vm5, %v372_v22, %v370_v23 }
 0x1d6   : > { %v376_v29 = vmul.f32 %v4060_v24, %v373_v26 }
 0x1d8   : > { %3610 = vmatmul.mubr.msk.f32.vlgmr.msra.gmra.mrb[2].mxu0 %vm378_vm6, %v376_v29 }
 0x1d9   : > { %3908 = vmatpush3.bf16.msra.mxu0 %v4333_v25  ;;  %3620 = vmatprep.mubr.msk.f32.mxu0 %vm4198_vm0, %v4197_v1 }
 0x1da   : > { %3909 = vmatprep.subr.bf16.mxu0 %v4199_v3 }
 0x1dd   : > { %3911 = vmatpush3.bf16.msra.mxu0 %v4336_v30 }
 0x1de   : > { %3639 = vmatprep.subr.mxu0 %v4197_v1 }
 0x2ab   : > { %v452_v31 = vpop.f32.mrb[2].mxu0 }
 0x2ac   : > { %v456_v32 = vmul.f32 %v452_v31, %v283_v10  ;;  %v3611_v33 = vpop.f32.mrb[3].mxu0 }
 0x2ae   : > { %3621 = vmatmul.mubr.msk.f32.vlgmr.msra.gmra.mrb[4].mxu0 %vm292_vm2, %v456_v32 }
 0x2af   : > { %3640 = vmatpush3.msk.msra.mxu0 %vm382_vm3, %v4324_v13  ;;  %3641 = vmatprep.mubr.msk.f32.mxu0 %vm4198_vm0, %v4197_v1 }
 0x2b0   : > { %3918 = vmatprep.subr.bf16.mxu0 %v4199_v3 }
 0x381   : > { %v530_v34 = vpop.f32.mrb[4].mxu0 }
 0x382   : > { %v531_v35 = vadd.f32 1.0, %v530_v34  ;;  %v3622_v36 = vpop.f32.mrb[5].mxu0 }
 0x384   : > { %v535_v37 = vsel %vm534_vm7, %v531_v35, -inf }
 0x385   : > { %536 = vmax.xlane.f32.xlu0 %v535_v37 }
 0x412   : > { %v537_v38 = vpop.xlane.xlu0 %536 }
 0x413   : > { %v538_v39 = vsub.f32 %v531_v35, %v537_v38 }
 0x415   : > { %v539_v40 = vmul.f32 1.442695, %v538_v39 }
 0x417   : > { %4061 = vpow2.f32 %v539_v40 }
 0x421   : > { %v4062_v41 = vpop.eup %4061 }
 0x422   : > { %v541_v42 = vsel %vm534_vm7, %v4062_v41, 0.0 }
 0x423   : > { %542 = vadd.xlane.f32.xlu0 %v541_v42 }
 0x4b0   : > { %v543_v43 = vpop.xlane.xlu0 %542 }
 0x4b1   : > { %4063 = vrcp.f32 %v543_v43 }
 0x4bb   : > { %v4064_v44 = vpop.eup %4063 }
 0x4bc   : > { %v545_v45 = vmul.f32 %v4064_v44, %v4062_v41 }
 0x4be   : > { %3626 = vmatmul.mubr.msk.f32.vlgmr.msra.gmra.mrb[2].mxu1 %vm213_vm1, %v545_v45 }
 0x4bf   : > { %3914 = vmatpush3.bf16.msra.mxu1 %v4289_v4  ;;  %3636 = vmatprep.mubr.msk.f32.mxu1 %vm4198_vm0, %v4197_v1 }
 0x4c0   : > { %3915 = vmatprep.subr.bf16.mxu1 %v4199_v3 }
 0x4c3   : > { %3917 = vmatpush3.bf16.msra.mxu1 %v4312_v9 }
 0x4c4   : > { %3655 = vmatprep.subr.mxu1 %v4197_v1 }
 0x591   : > { %v615_v46 = vpop.f32.mrb[2].mxu1 }
 0x592   : > { %v619_v47 = vmul.f32 %v615_v46, %v615_v46  ;;  %v3627_v48 = vpop.f32.mrb[3].mxu1 }
 0x594   : > { %3637 = vmatmul.mubr.msk.f32.vlgmr.msra.gmra.mrb[4].mxu1 %vm292_vm2, %v619_v47 }
 0x595   : > { %3656 = vmatpush3.msra.mxu1 %v4299_v5  ;;  %3657 = vmatprep.mubr.msk.f32.mxu1 %vm4198_vm0, %v4197_v1 }
 0x596   : > { %3924 = vmatprep.subr.bf16.mxu1 %v4199_v3 }
 0x667   : > { %v689_v49 = vpop.f32.mrb[4].mxu1 }
 0x668   : > { %v693_v50 = vadd.f32 1e-12, %v689_v49  ;;  %v3638_v51 = vpop.f32.mrb[5].mxu1  ;;  %v701_v52 = vadd.f32 1.0, %v689_v49 }
 0x66a   : > { %4065 = vrsqrt.f32 %v693_v50  ;;  %vm696_vm8 = vcmp.eq.f32.partialorder %v693_v50, inf  ;;  %v699_v55 = vand.u32 2147483648, %v693_v50  ;;  %vm698_vm9 = vcmp.eq.f32.partialorder %v693_v50, 0.0 }
 0x66b   : > { %4067 = vrcp.f32 %v701_v52 }
 0x674   : > { %v4066_v53 = vpop.eup %4065 }
 0x675   : > { %v695_v54 = vmul.f32 %v4066_v53, %v693_v50  ;;  %v4068_v57 = vpop.eup %4067 }
 0x677   : > { %v697_v56 = vsel %vm696_vm8, %v693_v50, %v695_v54 }
 0x678   : > { %v700_v58 = vsel %vm698_vm9, %v699_v55, %v697_v56 }
 0x679   : > { %v703_v59 = vmul.f32 %v4068_v57, %v700_v58 }
 0x67b   : > { %3642 = vmatmul.mubr.msk.f32.vlgmr.msra.gmra.mrb[6].mxu0 %vm378_vm6, %v703_v59 }
 0x67c   : > { %3920 = vmatpush3.bf16.msra.mxu0 %v4333_v25  ;;  %3652 = vmatprep.mubr.msk.f32.mxu0 %vm4198_vm0, %v4197_v1 }
 0x67d   : > { %3921 = vmatprep.subr.bf16.mxu0 %v4199_v3 }
 0x680   : > { %3923 = vmatpush3.bf16.msra.mxu0 %v4336_v30 }
 0x681   : > { %3671 = vmatprep.subr.mxu0 %v4197_v1 }
 0x74e   : > { %v773_v60 = vpop.f32.mrb[6].mxu0 }
 0x74f   : > { %v777_v61 = vmul.f32 %v773_v60, %v615_v46  ;;  %v3643_v62 = vpop.f32.mrb[7].mxu0 }
 0x751   : > { %3653 = vmatmul.mubr.msk.f32.vlgmr.msra.gmra.mrb[8].mxu0 %vm292_vm2, %v777_v61 }
 0x752   : > { %3672 = vmatpush3.msk.msra.mxu0 %vm382_vm3, %v4324_v13  ;;  %3673 = vmatprep.mubr.msk.f32.mxu0 %vm4198_vm0, %v4197_v1 }
 0x753   : > { %3930 = vmatprep.subr.bf16.mxu0 %v4199_v3 }
 0x824   : > { %v847_v63 = vpop.f32.mrb[8].mxu0 }
 0x825   : > { %v851_v0 = vadd.f32 %v847_v63, %v531_v35  ;;  %v3654_v2 = vpop.f32.mrb[9].mxu0 }
 0x827   : > { %v852_v6 = vsel %vm534_vm7, %v851_v0, -inf }
 0x828   : > { %853 = vmax.xlane.f32.xlu1 %v852_v6 }
 0x8b5   : > { %v854_v7 = vpop.xlane.xlu1 %853 }
 0x8b6   : > { %v855_v8 = vsub.f32 %v851_v0, %v854_v7 }
 0x8b8   : > { %v856_v10 = vmul.f32 1.442695, %v855_v8 }
 0x8ba   : > { %4069 = vpow2.f32 %v856_v10 }
 0x8c4   : > { %v4070_v11 = vpop.eup %4069 }
 0x8c5   : > { %v858_v12 = vsel %vm534_vm7, %v4070_v11, 0.0 }
 0x8c6   : > { %859 = vadd.xlane.f32.xlu1 %v858_v12 }
 0x953   : > { %v860_v14 = vpop.xlane.xlu1 %859 }
 0x954   : > { %4071 = vrcp.f32 %v860_v14 }
 0x95e   : > { %v4072_v15 = vpop.eup %4071 }
 0x95f   : > { %v862_v16 = vmul.f32 %v4072_v15, %v4070_v11 }
 0x961   : > { %3658 = vmatmul.mubr.msk.f32.vlgmr.msra.gmra.mrb[6].mxu1 %vm213_vm1, %v862_v16 }
 0x962   : > { %3926 = vmatpush3.bf16.msra.mxu1 %v4289_v4  ;;  %3668 = vmatprep.mubr.msk.f32.mxu1 %vm4198_vm0, %v4197_v1 }
 0x963   : > { %3927 = vmatprep.subr.bf16.mxu1 %v4199_v3 }
 0x966   : > { %3929 = vmatpush3.bf16.msra.mxu1 %v4312_v9 }
 0x967   : > { %3687 = vmatprep.subr.mxu1 %v4197_v1 }
 0xa34   : > { %v932_v17 = vpop.f32.mrb[6].mxu1 }
 0xa35   : > { %v936_v18 = vmul.f32 %v932_v17, %v932_v17  ;;  %v3659_v19 = vpop.f32.mrb[7].mxu1 }
 0xa37   : > { %3669 = vmatmul.mubr.msk.f32.vlgmr.msra.gmra.mrb[8].mxu1 %vm292_vm2, %v936_v18 }
 0xa38   : > { %3688 = vmatpush3.msra.mxu1 %v4299_v5  ;;  %3689 = vmatprep.mubr.msk.f32.mxu1 %vm4198_vm0, %v4197_v1 }
 0xa39   : > { %3936 = vmatprep.subr.bf16.mxu1 %v4199_v3 }
 0xb0a   : > { %v1006_v20 = vpop.f32.mrb[8].mxu1 }
 0xb0b   : > { %v1010_v21 = vadd.f32 1e-12, %v1006_v20  ;;  %v3670_v22 = vpop.f32.mrb[9].mxu1  ;;  %v1018_v23 = vadd.f32 1.0, %v1006_v20 }
 0xb0d   : > { %4073 = vrsqrt.f32 %v1010_v21  ;;  %vm1013_vm10 = vcmp.eq.f32.partialorder %v1010_v21, inf  ;;  %v1016_v27 = vand.u32 2147483648, %v1010_v21  ;;  %vm1015_vm11 = vcmp.eq.f32.partialorder %v1010_v21, 0.0 }
 0xb0e   : > { %4075 = vrcp.f32 %v1018_v23 }
 0xb17   : > { %v4074_v24 = vpop.eup %4073 }
 0xb18   : > { %v1012_v26 = vmul.f32 %v4074_v24, %v1010_v21  ;;  %v4076_v29 = vpop.eup %4075 }
 0xb1a   : > { %v1014_v28 = vsel %vm1013_vm10, %v1010_v21, %v1012_v26 }
 0xb1b   : > { %v1017_v31 = vsel %vm1015_vm11, %v1016_v27, %v1014_v28 }
 0xb1c   : > { %v1020_v32 = vmul.f32 %v4076_v29, %v1017_v31 }
 0xb1e   : > { %3674 = vmatmul.mubr.msk.f32.vlgmr.msra.gmra.mrb[10].mxu0 %vm378_vm6, %v1020_v32 }
 0xb1f   : > { %3932 = vmatpush3.bf16.msra.mxu0 %v4333_v25  ;;  %3684 = vmatprep.mubr.msk.f32.mxu0 %vm4198_vm0, %v4197_v1 }
 0xb20   : > { %3933 = vmatprep.subr.bf16.mxu0 %v4199_v3 }
 0xb23   : > { %3935 = vmatpush3.bf16.msra.mxu0 %v4336_v30 }
 0xb24   : > { %3703 = vmatprep.subr.mxu0 %v4197_v1 }
 0xbf1   : > { %v1090_v33 = vpop.f32.mrb[10].mxu0 }
 0xbf2   : > { %v1094_v34 = vmul.f32 %v1090_v33, %v932_v17  ;;  %v3675_v35 = vpop.f32.mrb[11].mxu0 }
 0xbf4   : > { %3685 = vmatmul.mubr.msk.f32.vlgmr.msra.gmra.mrb[12].mxu0 %vm292_vm2, %v1094_v34 }
 0xbf5   : > { %3704 = vmatpush3.msk.msra.mxu0 %vm382_vm3, %v4324_v13  ;;  %3705 = vmatprep.mubr.msk.f32.mxu0 %vm4198_vm0, %v4197_v1 }
 0xbf6   : > { %3942 = vmatprep.subr.bf16.mxu0 %v4199_v3 }
 0xcc7   : > { %v1164_v36 = vpop.f32.mrb[12].mxu0 }
 0xcc8   : > { %v1168_v37 = vadd.f32 %v1164_v36, %v851_v0  ;;  %v3686_v38 = vpop.f32.mrb[13].mxu0 }
 0xcca   : > { %v1169_v39 = vsel %vm534_vm7, %v1168_v37, -inf }
 0xccb   : > { %1170 = vmax.xlane.f32.xlu0 %v1169_v39 }
 0xd58   : > { %v1171_v40 = vpop.xlane.xlu0 %1170 }
 0xd59   : > { %v1172_v41 = vsub.f32 %v1168_v37, %v1171_v40 }
 0xd5b   : > { %v1173_v42 = vmul.f32 1.442695, %v1172_v41 }
 0xd5d   : > { %4077 = vpow2.f32 %v1173_v42 }
 0xd67   : > { %v4078_v43 = vpop.eup %4077 }
 0xd68   : > { %v1175_v44 = vsel %vm534_vm7, %v4078_v43, 0.0 }
 0xd69   : > { %1176 = vadd.xlane.f32.xlu1 %v1175_v44 }
 0xdf6   : > { %v1177_v45 = vpop.xlane.xlu1 %1176 }
 0xdf7   : > { %4079 = vrcp.f32 %v1177_v45 }
 0xe01   : > { %v4080_v46 = vpop.eup %4079 }
 0xe02   : > { %v1179_v47 = vmul.f32 %v4080_v46, %v4078_v43 }
 0xe04   : > { %3690 = vmatmul.mubr.msk.f32.vlgmr.msra.gmra.mrb[10].mxu1 %vm213_vm1, %v1179_v47 }
 0xe05   : > { %3938 = vmatpush3.bf16.msra.mxu1 %v4289_v4  ;;  %3700 = vmatprep.mubr.msk.f32.mxu1 %vm4198_vm0, %v4197_v1 }
 0xe06   : > { %3939 = vmatprep.subr.bf16.mxu1 %v4199_v3 }
 0xe09   : > { %3941 = vmatpush3.bf16.msra.mxu1 %v4312_v9 }
 0xe0a   : > { %3719 = vmatprep.subr.mxu1 %v4197_v1 }
 0xed7   : > { %v1249_v48 = vpop.f32.mrb[10].mxu1 }
 0xed8   : > { %v1253_v49 = vmul.f32 %v1249_v48, %v1249_v48  ;;  %v3691_v50 = vpop.f32.mrb[11].mxu1 }
 0xeda   : > { %3701 = vmatmul.mubr.msk.f32.vlgmr.msra.gmra.mrb[12].mxu1 %vm292_vm2, %v1253_v49 }
 0xedb   : > { %3720 = vmatpush3.msra.mxu1 %v4299_v5  ;;  %3721 = vmatprep.mubr.msk.f32.mxu1 %vm4198_vm0, %v4197_v1 }
 0xedc   : > { %3948 = vmatprep.subr.bf16.mxu1 %v4199_v3 }
 0xfad   : > { %v1323_v51 = vpop.f32.mrb[12].mxu1 }
 0xfae   : > { %v1327_v52 = vadd.f32 1e-12, %v1323_v51  ;;  %v3702_v53 = vpop.f32.mrb[13].mxu1  ;;  %v1335_v54 = vadd.f32 1.0, %v1323_v51 }
 0xfb0   : > { %4081 = vrsqrt.f32 %v1327_v52  ;;  %vm1330_vm12 = vcmp.eq.f32.partialorder %v1327_v52, inf  ;;  %v1333_v57 = vand.u32 2147483648, %v1327_v52  ;;  %vm1332_vm13 = vcmp.eq.f32.partialorder %v1327_v52, 0.0 }
 0xfb1   : > { %4083 = vrcp.f32 %v1335_v54 }
 0xfba   : > { %v4082_v55 = vpop.eup %4081 }
 0xfbb   : > { %v1329_v56 = vmul.f32 %v4082_v55, %v1327_v52  ;;  %v4084_v59 = vpop.eup %4083 }
 0xfbd   : > { %v1331_v58 = vsel %vm1330_vm12, %v1327_v52, %v1329_v56 }
 0xfbe   : > { %v1334_v60 = vsel %vm1332_vm13, %v1333_v57, %v1331_v58 }
 0xfbf   : > { %v1337_v61 = vmul.f32 %v4084_v59, %v1334_v60 }
 0xfc1   : > { %3706 = vmatmul.mubr.msk.f32.vlgmr.msra.gmra.mrb[14].mxu0 %vm378_vm6, %v1337_v61 }
 0xfc2   : > { %3944 = vmatpush3.bf16.msra.mxu0 %v4333_v25  ;;  %3716 = vmatprep.mubr.msk.f32.mxu0 %vm4198_vm0, %v4197_v1 }
 0xfc3   : > { %3945 = vmatprep.subr.bf16.mxu0 %v4199_v3 }
 0xfc6   : > { %3947 = vmatpush3.bf16.msra.mxu0 %v4336_v30 }
 0xfc7   : > { %3735 = vmatprep.subr.mxu0 %v4197_v1 }
0x1094   : > { %v1407_v62 = vpop.f32.mrb[14].mxu0 }
0x1095   : > { %v1411_v63 = vmul.f32 %v1407_v62, %v1249_v48  ;;  %v3707_v0 = vpop.f32.mrb[15].mxu0 }
0x1097   : > { %3717 = vmatmul.mubr.msk.f32.vlgmr.msra.gmra.mrb[16].mxu0 %vm292_vm2, %v1411_v63 }
0x1098   : > { %3736 = vmatpush3.msk.msra.mxu0 %vm382_vm3, %v4324_v13  ;;  %3737 = vmatprep.mubr.msk.f32.mxu0 %vm4198_vm0, %v4197_v1 }
0x1099   : > { %3954 = vmatprep.subr.bf16.mxu0 %v4199_v3 }
0x116a   : > { %v1481_v2 = vpop.f32.mrb[16].mxu0 }
0x116b   : > { %v1485_v6 = vadd.f32 %v1481_v2, %v1168_v37  ;;  %v3718_v7 = vpop.f32.mrb[17].mxu0 }
0x116d   : > { %v1486_v8 = vsel %vm534_vm7, %v1485_v6, -inf }
0x116e   : > { %1487 = vmax.xlane.f32.xlu0 %v1486_v8 }
0x11fb   : > { %v1488_v10 = vpop.xlane.xlu0 %1487 }
0x11fc   : > { %v1489_v11 = vsub.f32 %v1485_v6, %v1488_v10 }
0x11fe   : > { %v1490_v12 = vmul.f32 1.442695, %v1489_v11 }
0x1200   : > { %4085 = vpow2.f32 %v1490_v12 }
0x120a   : > { %v4086_v14 = vpop.eup %4085 }
0x120b   : > { %v1492_v15 = vsel %vm534_vm7, %v4086_v14, 0.0 }
0x120c   : > { %1493 = vadd.xlane.f32.xlu1 %v1492_v15 }
0x1299   : > { %v1494_v16 = vpop.xlane.xlu1 %1493 }
0x129a   : > { %4087 = vrcp.f32 %v1494_v16 }
0x12a4   : > { %v4088_v17 = vpop.eup %4087 }
0x12a5   : > { %v1496_v18 = vmul.f32 %v4088_v17, %v4086_v14 }
0x12a7   : > { %3722 = vmatmul.mubr.msk.f32.vlgmr.msra.gmra.mrb[14].mxu1 %vm213_vm1, %v1496_v18 }
0x12a8   : > { %3950 = vmatpush3.bf16.msra.mxu1 %v4289_v4  ;;  %3732 = vmatprep.mubr.msk.f32.mxu1 %vm4198_vm0, %v4197_v1 }
0x12a9   : > { %3951 = vmatprep.subr.bf16.mxu1 %v4199_v3 }
0x12ac   : > { %3953 = vmatpush3.bf16.msra.mxu1 %v4312_v9 }
0x12ad   : > { %3751 = vmatprep.subr.mxu1 %v4197_v1 }
0x137a   : > { %v1566_v19 = vpop.f32.mrb[14].mxu1 }
0x137b   : > { %v1570_v20 = vmul.f32 %v1566_v19, %v1566_v19  ;;  %v3723_v21 = vpop.f32.mrb[15].mxu1 }
0x137d   : > { %3733 = vmatmul.mubr.msk.f32.vlgmr.msra.gmra.mrb[16].mxu1 %vm292_vm2, %v1570_v20 }
0x137e   : > { %3752 = vmatpush3.msra.mxu1 %v4299_v5  ;;  %3753 = vmatprep.mubr.msk.f32.mxu1 %vm4198_vm0, %v4197_v1 }
0x137f   : > { %3960 = vmatprep.subr.bf16.mxu1 %v4199_v3 }
0x1450   : > { %v1640_v22 = vpop.f32.mrb[16].mxu1 }
0x1451   : > { %v1644_v23 = vadd.f32 1e-12, %v1640_v22  ;;  %v3734_v24 = vpop.f32.mrb[17].mxu1  ;;  %v1652_v26 = vadd.f32 1.0, %v1640_v22 }
0x1453   : > { %4089 = vrsqrt.f32 %v1644_v23  ;;  %vm1647_vm14 = vcmp.eq.f32.partialorder %v1644_v23, inf  ;;  %v1650_v29 = vand.u32 2147483648, %v1644_v23  ;;  %vm1649_vm15 = vcmp.eq.f32.partialorder %v1644_v23, 0.0 }
0x1454   : > { %4091 = vrcp.f32 %v1652_v26 }
0x145d   : > { %v4090_v27 = vpop.eup %4089 }
0x145e   : > { %v1646_v28 = vmul.f32 %v4090_v27, %v1644_v23  ;;  %v4092_v32 = vpop.eup %4091 }
0x1460   : > { %v1648_v31 = vsel %vm1647_vm14, %v1644_v23, %v1646_v28 }
0x1461   : > { %v1651_v33 = vsel %vm1649_vm15, %v1650_v29, %v1648_v31 }
0x1462   : > { %v1654_v34 = vmul.f32 %v4092_v32, %v1651_v33 }
0x1464   : > { %3738 = vmatmul.mubr.msk.f32.vlgmr.msra.gmra.mrb[18].mxu0 %vm378_vm6, %v1654_v34 }
0x1465   : > { %3956 = vmatpush3.bf16.msra.mxu0 %v4333_v25  ;;  %3748 = vmatprep.mubr.msk.f32.mxu0 %vm4198_vm0, %v4197_v1 }
0x1466   : > { %3957 = vmatprep.subr.bf16.mxu0 %v4199_v3 }
0x1469   : > { %3959 = vmatpush3.bf16.msra.mxu0 %v4336_v30 }
0x146a   : > { %3767 = vmatprep.subr.mxu0 %v4197_v1 }
0x1537   : > { %v1724_v35 = vpop.f32.mrb[18].mxu0 }
0x1538   : > { %v1728_v36 = vmul.f32 %v1724_v35, %v1566_v19  ;;  %v3739_v37 = vpop.f32.mrb[19].mxu0 }
0x153a   : > { %3749 = vmatmul.mubr.msk.f32.vlgmr.msra.gmra.mrb[20].mxu0 %vm292_vm2, %v1728_v36 }
0x153b   : > { %3768 = vmatpush3.msk.msra.mxu0 %vm382_vm3, %v4324_v13  ;;  %3769 = vmatprep.mubr.msk.f32.mxu0 %vm4198_vm0, %v4197_v1 }
0x153c   : > { %3966 = vmatprep.subr.bf16.mxu0 %v4199_v3 }
0x160d   : > { %v1798_v38 = vpop.f32.mrb[20].mxu0 }
0x160e   : > { %v1802_v39 = vadd.f32 %v1798_v38, %v1485_v6  ;;  %v3750_v40 = vpop.f32.mrb[21].mxu0 }
0x1610   : > { %v1803_v41 = vsel %vm534_vm7, %v1802_v39, -inf }
0x1611   : > { %1804 = vmax.xlane.f32.xlu0 %v1803_v41 }
0x169e   : > { %v1805_v42 = vpop.xlane.xlu0 %1804 }
0x169f   : > { %v1806_v43 = vsub.f32 %v1802_v39, %v1805_v42 }
0x16a1   : > { %v1807_v44 = vmul.f32 1.442695, %v1806_v43 }
0x16a3   : > { %4093 = vpow2.f32 %v1807_v44 }
0x16ad   : > { %v4094_v45 = vpop.eup %4093 }
0x16ae   : > { %v1809_v46 = vsel %vm534_vm7, %v4094_v45, 0.0 }
0x16af   : > { %1810 = vadd.xlane.f32.xlu1 %v1809_v46 }
0x173c   : > { %v1811_v47 = vpop.xlane.xlu1 %1810 }
0x173d   : > { %4095 = vrcp.f32 %v1811_v47 }
0x1747   : > { %v4096_v48 = vpop.eup %4095 }
0x1748   : > { %v1813_v49 = vmul.f32 %v4096_v48, %v4094_v45 }
0x174a   : > { %3754 = vmatmul.mubr.msk.f32.vlgmr.msra.gmra.mrb[18].mxu1 %vm213_vm1, %v1813_v49 }
0x174b   : > { %3962 = vmatpush3.bf16.msra.mxu1 %v4289_v4  ;;  %3764 = vmatprep.mubr.msk.f32.mxu1 %vm4198_vm0, %v4197_v1 }
0x174c   : > { %3963 = vmatprep.subr.bf16.mxu1 %v4199_v3 }
0x174f   : > { %3965 = vmatpush3.bf16.msra.mxu1 %v4312_v9 }
0x1750   : > { %3783 = vmatprep.subr.mxu1 %v4197_v1 }
0x181d   : > { %v1883_v50 = vpop.f32.mrb[18].mxu1 }
0x181e   : > { %v1887_v51 = vmul.f32 %v1883_v50, %v1883_v50  ;;  %v3755_v52 = vpop.f32.mrb[19].mxu1 }
0x1820   : > { %3765 = vmatmul.mubr.msk.f32.vlgmr.msra.gmra.mrb[20].mxu1 %vm292_vm2, %v1887_v51 }
0x1821   : > { %3784 = vmatpush3.msra.mxu1 %v4299_v5  ;;  %3785 = vmatprep.mubr.msk.f32.mxu1 %vm4198_vm0, %v4197_v1 }
0x1822   : > { %3972 = vmatprep.subr.bf16.mxu1 %v4199_v3 }
0x18f3   : > { %v1957_v53 = vpop.f32.mrb[20].mxu1 }
0x18f4   : > { %v1961_v54 = vadd.f32 1e-12, %v1957_v53  ;;  %v3766_v55 = vpop.f32.mrb[21].mxu1  ;;  %v1969_v56 = vadd.f32 1.0, %v1957_v53 }
0x18f6   : > { %4097 = vrsqrt.f32 %v1961_v54  ;;  %vm1964_vm4 = vcmp.eq.f32.partialorder %v1961_v54, inf  ;;  %v1967_v59 = vand.u32 2147483648, %v1961_v54  ;;  %vm1966_vm5 = vcmp.eq.f32.partialorder %v1961_v54, 0.0 }
0x18f7   : > { %4099 = vrcp.f32 %v1969_v56 }
0x1900   : > { %v4098_v57 = vpop.eup %4097 }
0x1901   : > { %v1963_v58 = vmul.f32 %v4098_v57, %v1961_v54  ;;  %v4100_v61 = vpop.eup %4099 }
0x1903   : > { %v1965_v60 = vsel %vm1964_vm4, %v1961_v54, %v1963_v58 }
0x1904   : > { %v1968_v62 = vsel %vm1966_vm5, %v1967_v59, %v1965_v60 }
0x1905   : > { %v1971_v63 = vmul.f32 %v4100_v61, %v1968_v62 }
0x1907   : > { %3770 = vmatmul.mubr.msk.f32.vlgmr.msra.gmra.mrb[22].mxu0 %vm378_vm6, %v1971_v63 }
0x1908   : > { %3968 = vmatpush3.bf16.msra.mxu0 %v4333_v25  ;;  %3780 = vmatprep.mubr.msk.f32.mxu0 %vm4198_vm0, %v4197_v1 }
0x1909   : > { %3969 = vmatprep.subr.bf16.mxu0 %v4199_v3 }
0x190c   : > { %3971 = vmatpush3.bf16.msra.mxu0 %v4336_v30 }
0x190d   : > { %3799 = vmatprep.subr.mxu0 %v4197_v1 }
0x19da   : > { %v2041_v0 = vpop.f32.mrb[22].mxu0 }
0x19db   : > { %v2045_v2 = vmul.f32 %v2041_v0, %v1883_v50  ;;  %v3771_v6 = vpop.f32.mrb[23].mxu0 }
0x19dd   : > { %3781 = vmatmul.mubr.msk.f32.vlgmr.msra.gmra.mrb[24].mxu0 %vm292_vm2, %v2045_v2 }
0x19de   : > { %3800 = vmatpush3.msk.msra.mxu0 %vm382_vm3, %v4324_v13  ;;  %3801 = vmatprep.mubr.msk.f32.mxu0 %vm4198_vm0, %v4197_v1 }
0x19df   : > { %3978 = vmatprep.subr.bf16.mxu0 %v4199_v3 }
0x1ab0   : > { %v2115_v7 = vpop.f32.mrb[24].mxu0 }
0x1ab1   : > { %v2119_v8 = vadd.f32 %v2115_v7, %v1802_v39  ;;  %v3782_v10 = vpop.f32.mrb[25].mxu0 }
0x1ab3   : > { %v2120_v11 = vsel %vm534_vm7, %v2119_v8, -inf }
0x1ab4   : > { %2121 = vmax.xlane.f32.xlu0 %v2120_v11 }
0x1b41   : > { %v2122_v12 = vpop.xlane.xlu0 %2121 }
0x1b42   : > { %v2123_v14 = vsub.f32 %v2119_v8, %v2122_v12 }
0x1b44   : > { %v2124_v15 = vmul.f32 1.442695, %v2123_v14 }
0x1b46   : > { %4101 = vpow2.f32 %v2124_v15 }
0x1b50   : > { %v4102_v16 = vpop.eup %4101 }
0x1b51   : > { %v2126_v17 = vsel %vm534_vm7, %v4102_v16, 0.0 }
0x1b52   : > { %2127 = vadd.xlane.f32.xlu1 %v2126_v17 }
0x1bdf   : > { %v2128_v18 = vpop.xlane.xlu1 %2127 }
0x1be0   : > { %4103 = vrcp.f32 %v2128_v18 }
0x1bea   : > { %v4104_v19 = vpop.eup %4103 }
0x1beb   : > { %v2130_v20 = vmul.f32 %v4104_v19, %v4102_v16 }
0x1bed   : > { %3786 = vmatmul.mubr.msk.f32.vlgmr.msra.gmra.mrb[22].mxu1 %vm213_vm1, %v2130_v20 }
0x1bee   : > { %3974 = vmatpush3.bf16.msra.mxu1 %v4289_v4  ;;  %3796 = vmatprep.mubr.msk.f32.mxu1 %vm4198_vm0, %v4197_v1 }
0x1bef   : > { %3975 = vmatprep.subr.bf16.mxu1 %v4199_v3 }
0x1bf2   : > { %3977 = vmatpush3.bf16.msra.mxu1 %v4312_v9 }
0x1bf3   : > { %3815 = vmatprep.subr.mxu1 %v4197_v1 }
0x1cc0   : > { %v2200_v21 = vpop.f32.mrb[22].mxu1 }
0x1cc1   : > { %v2204_v22 = vmul.f32 %v2200_v21, %v2200_v21  ;;  %v3787_v23 = vpop.f32.mrb[23].mxu1 }
0x1cc3   : > { %3797 = vmatmul.mubr.msk.f32.vlgmr.msra.gmra.mrb[24].mxu1 %vm292_vm2, %v2204_v22 }
0x1cc4   : > { %3816 = vmatpush3.msra.mxu1 %v4299_v5  ;;  %3817 = vmatprep.mubr.msk.f32.mxu1 %vm4198_vm0, %v4197_v1 }
0x1cc5   : > { %3984 = vmatprep.subr.bf16.mxu1 %v4199_v3 }
0x1d96   : > { %v2274_v24 = vpop.f32.mrb[24].mxu1 }
0x1d97   : > { %v2278_v26 = vadd.f32 1e-12, %v2274_v24  ;;  %v3798_v27 = vpop.f32.mrb[25].mxu1  ;;  %v2286_v28 = vadd.f32 1.0, %v2274_v24 }
0x1d99   : > { %4105 = vrsqrt.f32 %v2278_v26  ;;  %vm2281_vm8 = vcmp.eq.f32.partialorder %v2278_v26, inf  ;;  %v2284_v32 = vand.u32 2147483648, %v2278_v26  ;;  %vm2283_vm9 = vcmp.eq.f32.partialorder %v2278_v26, 0.0 }
0x1d9a   : > { %4107 = vrcp.f32 %v2286_v28 }
0x1da3   : > { %v4106_v29 = vpop.eup %4105 }
0x1da4   : > { %v2280_v31 = vmul.f32 %v4106_v29, %v2278_v26  ;;  %v4108_v34 = vpop.eup %4107 }
0x1da6   : > { %v2282_v33 = vsel %vm2281_vm8, %v2278_v26, %v2280_v31 }
0x1da7   : > { %v2285_v35 = vsel %vm2283_vm9, %v2284_v32, %v2282_v33 }
0x1da8   : > { %v2288_v36 = vmul.f32 %v4108_v34, %v2285_v35 }
0x1daa   : > { %3802 = vmatmul.mubr.msk.f32.vlgmr.msra.gmra.mrb[26].mxu0 %vm378_vm6, %v2288_v36 }
0x1dab   : > { %3980 = vmatpush3.bf16.msra.mxu0 %v4333_v25  ;;  %3812 = vmatprep.mubr.msk.f32.mxu0 %vm4198_vm0, %v4197_v1 }
0x1dac   : > { %3981 = vmatprep.subr.bf16.mxu0 %v4199_v3 }
0x1daf   : > { %3983 = vmatpush3.bf16.msra.mxu0 %v4336_v30 }
0x1db0   : > { %3831 = vmatprep.subr.mxu0 %v4197_v1 }
0x1e7d   : > { %v2358_v37 = vpop.f32.mrb[26].mxu0 }
0x1e7e   : > { %v2362_v38 = vmul.f32 %v2358_v37, %v2200_v21  ;;  %v3803_v39 = vpop.f32.mrb[27].mxu0 }
0x1e80   : > { %3813 = vmatmul.mubr.msk.f32.vlgmr.msra.gmra.mrb[28].mxu0 %vm292_vm2, %v2362_v38 }
0x1e81   : > { %3832 = vmatpush3.msk.msra.mxu0 %vm382_vm3, %v4324_v13  ;;  %3833 = vmatprep.mubr.msk.f32.mxu0 %vm4198_vm0, %v4197_v1 }
0x1e82   : > { %3990 = vmatprep.subr.bf16.mxu0 %v4199_v3 }
0x1f53   : > { %v2432_v40 = vpop.f32.mrb[28].mxu0 }
0x1f54   : > { %v2436_v41 = vadd.f32 %v2432_v40, %v2119_v8  ;;  %v3814_v42 = vpop.f32.mrb[29].mxu0 }
0x1f56   : > { %v2437_v43 = vsel %vm534_vm7, %v2436_v41, -inf }
0x1f57   : > { %2438 = vmax.xlane.f32.xlu0 %v2437_v43 }
0x1fe4   : > { %v2439_v44 = vpop.xlane.xlu0 %2438 }
0x1fe5   : > { %v2440_v45 = vsub.f32 %v2436_v41, %v2439_v44 }
0x1fe7   : > { %v2441_v46 = vmul.f32 1.442695, %v2440_v45 }
0x1fe9   : > { %4109 = vpow2.f32 %v2441_v46 }
0x1ff3   : > { %v4110_v47 = vpop.eup %4109 }
0x1ff4   : > { %v2443_v48 = vsel %vm534_vm7, %v4110_v47, 0.0 }
0x1ff5   : > { %2444 = vadd.xlane.f32.xlu1 %v2443_v48 }
0x2082   : > { %v2445_v49 = vpop.xlane.xlu1 %2444 }
0x2083   : > { %4111 = vrcp.f32 %v2445_v49 }
0x208d   : > { %v4112_v50 = vpop.eup %4111 }
0x208e   : > { %v2447_v51 = vmul.f32 %v4112_v50, %v4110_v47 }
0x2090   : > { %3818 = vmatmul.mubr.msk.f32.vlgmr.msra.gmra.mrb[26].mxu1 %vm213_vm1, %v2447_v51 }
0x2091   : > { %3986 = vmatpush3.bf16.msra.mxu1 %v4289_v4  ;;  %3828 = vmatprep.mubr.msk.f32.mxu1 %vm4198_vm0, %v4197_v1 }
0x2092   : > { %3987 = vmatprep.subr.bf16.mxu1 %v4199_v3 }
0x2095   : > { %3989 = vmatpush3.bf16.msra.mxu1 %v4312_v9 }
0x2096   : > { %3847 = vmatprep.subr.mxu1 %v4197_v1 }
0x2163   : > { %v2517_v52 = vpop.f32.mrb[26].mxu1 }
0x2164   : > { %v2521_v53 = vmul.f32 %v2517_v52, %v2517_v52  ;;  %v3819_v54 = vpop.f32.mrb[27].mxu1 }
0x2166   : > { %3829 = vmatmul.mubr.msk.f32.vlgmr.msra.gmra.mrb[28].mxu1 %vm292_vm2, %v2521_v53 }
0x2167   : > { %3848 = vmatpush3.msra.mxu1 %v4299_v5  ;;  %3849 = vmatprep.mubr.msk.f32.mxu1 %vm4198_vm0, %v4197_v1 }
0x2168   : > { %3996 = vmatprep.subr.bf16.mxu1 %v4199_v3 }
0x2239   : > { %v2591_v55 = vpop.f32.mrb[28].mxu1 }
0x223a   : > { %v2595_v56 = vadd.f32 1e-12, %v2591_v55  ;;  %v3830_v57 = vpop.f32.mrb[29].mxu1  ;;  %v2603_v58 = vadd.f32 1.0, %v2591_v55 }
0x223c   : > { %4113 = vrsqrt.f32 %v2595_v56  ;;  %vm2598_vm10 = vcmp.eq.f32.partialorder %v2595_v56, inf  ;;  %v2601_v61 = vand.u32 2147483648, %v2595_v56  ;;  %vm2600_vm11 = vcmp.eq.f32.partialorder %v2595_v56, 0.0 }
0x223d   : > { %4115 = vrcp.f32 %v2603_v58 }
0x2246   : > { %v4114_v59 = vpop.eup %4113 }
0x2247   : > { %v2597_v60 = vmul.f32 %v4114_v59, %v2595_v56  ;;  %v4116_v63 = vpop.eup %4115 }
0x2249   : > { %v2599_v62 = vsel %vm2598_vm10, %v2595_v56, %v2597_v60 }
0x224a   : > { %v2602_v0 = vsel %vm2600_vm11, %v2601_v61, %v2599_v62 }
0x224b   : > { %v2605_v2 = vmul.f32 %v4116_v63, %v2602_v0 }
0x224d   : > { %3834 = vmatmul.mubr.msk.f32.vlgmr.msra.gmra.mrb[30].mxu0 %vm378_vm6, %v2605_v2 }
0x224e   : > { %3992 = vmatpush3.bf16.msra.mxu0 %v4333_v25  ;;  %3844 = vmatprep.mubr.msk.f32.mxu0 %vm4198_vm0, %v4197_v1 }
0x224f   : > { %3993 = vmatprep.subr.bf16.mxu0 %v4199_v3 }
0x2252   : > { %3995 = vmatpush3.bf16.msra.mxu0 %v4336_v30 }
0x2253   : > { %3863 = vmatprep.subr.mxu0 %v4197_v1 }
0x2320   : > { %v2675_v6 = vpop.f32.mrb[30].mxu0 }
0x2321   : > { %v2679_v7 = vmul.f32 %v2675_v6, %v2517_v52  ;;  %v3835_v8 = vpop.f32.mrb[31].mxu0 }
0x2323   : > { %3845 = vmatmul.mubr.msk.f32.vlgmr.msra.gmra.mrb[32].mxu0 %vm292_vm2, %v2679_v7 }
0x2324   : > { %3864 = vmatpush3.msk.msra.mxu0 %vm382_vm3, %v4324_v13  ;;  %3865 = vmatprep.mubr.msk.f32.mxu0 %vm4198_vm0, %v4197_v1 }
0x2325   : > { %4002 = vmatprep.subr.bf16.mxu0 %v4199_v3 }
0x23f6   : > { %v2749_v10 = vpop.f32.mrb[32].mxu0 }
0x23f7   : > { %v2753_v11 = vadd.f32 %v2749_v10, %v2436_v41  ;;  %v3846_v12 = vpop.f32.mrb[33].mxu0 }
0x23f9   : > { %v2754_v14 = vsel %vm534_vm7, %v2753_v11, -inf }
0x23fa   : > { %2755 = vmax.xlane.f32.xlu0 %v2754_v14 }
0x2487   : > { %v2756_v15 = vpop.xlane.xlu0 %2755 }
0x2488   : > { %v2757_v16 = vsub.f32 %v2753_v11, %v2756_v15 }
0x248a   : > { %v2758_v17 = vmul.f32 1.442695, %v2757_v16 }
0x248c   : > { %4117 = vpow2.f32 %v2758_v17 }
0x2496   : > { %v4118_v18 = vpop.eup %4117 }
0x2497   : > { %v2760_v19 = vsel %vm534_vm7, %v4118_v18, 0.0 }
0x2498   : > { %2761 = vadd.xlane.f32.xlu1 %v2760_v19 }
0x2525   : > { %v2762_v20 = vpop.xlane.xlu1 %2761 }
0x2526   : > { %4119 = vrcp.f32 %v2762_v20 }
0x2530   : > { %v4120_v21 = vpop.eup %4119 }
0x2531   : > { %v2764_v22 = vmul.f32 %v4120_v21, %v4118_v18 }
0x2533   : > { %3850 = vmatmul.mubr.msk.f32.vlgmr.msra.gmra.mrb[30].mxu1 %vm213_vm1, %v2764_v22 }
0x2534   : > { %3998 = vmatpush3.bf16.msra.mxu1 %v4289_v4  ;;  %3860 = vmatprep.mubr.msk.f32.mxu1 %vm4198_vm0, %v4197_v1 }
0x2535   : > { %3999 = vmatprep.subr.bf16.mxu1 %v4199_v3 }
0x2538   : > { %4001 = vmatpush3.bf16.msra.mxu1 %v4312_v9 }
0x2539   : > { %3879 = vmatprep.subr.mxu1 %v4197_v1 }
0x2606   : > { %v2834_v23 = vpop.f32.mrb[30].mxu1 }
0x2607   : > { %v2838_v24 = vmul.f32 %v2834_v23, %v2834_v23  ;;  %v3851_v26 = vpop.f32.mrb[31].mxu1 }
0x2609   : > { %3861 = vmatmul.mubr.msk.f32.vlgmr.msra.gmra.mrb[32].mxu1 %vm292_vm2, %v2838_v24 }
0x260a   : > { %3880 = vmatpush3.msra.mxu1 %v4299_v5  ;;  %3881 = vmatprep.mubr.msk.f32.mxu1 %vm4198_vm0, %v4197_v1 }
0x260b   : > { %4008 = vmatprep.subr.bf16.mxu1 %v4199_v3 }
0x26dc   : > { %v2908_v27 = vpop.f32.mrb[32].mxu1 }
0x26dd   : > { %v2912_v28 = vadd.f32 1e-12, %v2908_v27  ;;  %v3862_v29 = vpop.f32.mrb[33].mxu1  ;;  %v2920_v31 = vadd.f32 1.0, %v2908_v27 }
0x26df   : > { %4121 = vrsqrt.f32 %v2912_v28  ;;  %vm2915_vm12 = vcmp.eq.f32.partialorder %v2912_v28, inf  ;;  %v2918_v34 = vand.u32 2147483648, %v2912_v28  ;;  %vm2917_vm13 = vcmp.eq.f32.partialorder %v2912_v28, 0.0 }
0x26e0   : > { %4123 = vrcp.f32 %v2920_v31 }
0x26e9   : > { %v4122_v32 = vpop.eup %4121 }
0x26ea   : > { %v2914_v33 = vmul.f32 %v4122_v32, %v2912_v28  ;;  %v4124_v36 = vpop.eup %4123 }
0x26ec   : > { %v2916_v35 = vsel %vm2915_vm12, %v2912_v28, %v2914_v33 }
0x26ed   : > { %v2919_v37 = vsel %vm2917_vm13, %v2918_v34, %v2916_v35 }
0x26ee   : > { %v2922_v5 = vmul.f32 %v4124_v36, %v2919_v37 }
0x26f0   : > { %3866 = vmatmul.mubr.msk.f32.vlgmr.msra.gmra.mrb[34].mxu0 %vm378_vm6, %v2922_v5 }
0x26f1   : > { %4004 = vmatpush3.bf16.msra.mxu0 %v4333_v25  ;;  %3876 = vmatprep.mubr.msk.f32.mxu0 %vm4198_vm0, %v4197_v1 }
0x26f2   : > { %4005 = vmatprep.subr.bf16.mxu0 %v4199_v3 }
0x26f5   : > { %4007 = vmatpush3.bf16.msra.mxu0 %v4336_v30 }
0x26f6   : > { %3895 = vmatprep.subr.mxu0 %v4197_v1 }
0x27c3   : > { %v2992_v38 = vpop.f32.mrb[34].mxu0 }
0x27c4   : > { %v2996_v39 = vmul.f32 %v2992_v38, %v2834_v23  ;;  %v3867_v40 = vpop.f32.mrb[35].mxu0 }
0x27c6   : > { %3877 = vmatmul.mubr.msk.f32.vlgmr.msra.gmra.mrb[36].mxu0 %vm292_vm2, %v2996_v39 }
0x27c7   : > { %3896 = vmatpush3.msk.msra.mxu0 %vm382_vm3, %v4324_v13  ;;  %3897 = vmatprep.mubr.msk.f32.mxu0 %vm4198_vm0, %v4197_v1 }
0x2899   : > { %v3066_v25 = vpop.f32.mrb[36].mxu0 }
0x289a   : > { %v3070_v41 = vadd.f32 %v3066_v25, %v2753_v11  ;;  %v3878_v42 = vpop.f32.mrb[37].mxu0 }
0x289c   : > { %v3071_v43 = vsel %vm534_vm7, %v3070_v41, -inf }
0x289d   : > { %3072 = vmax.xlane.f32.xlu0 %v3071_v43 }
0x292a   : > { %v3073_v30 = vpop.xlane.xlu0 %3072 }
0x292b   : > { %v3074_v44 = vsub.f32 %v3070_v41, %v3073_v30 }
0x292d   : > { %v3075_v45 = vmul.f32 1.442695, %v3074_v44 }
0x292f   : > { %4125 = vpow2.f32 %v3075_v45 }
0x2939   : > { %v4126_v46 = vpop.eup %4125 }
0x293a   : > { %v3077_v47 = vsel %vm534_vm7, %v4126_v46, 0.0 }
0x293b   : > { %3078 = vadd.xlane.f32.xlu1 %v3077_v47 }
0x29c8   : > { %v3079_v48 = vpop.xlane.xlu1 %3078 }
0x29c9   : > { %4127 = vrcp.f32 %v3079_v48 }
0x29d3   : > { %v4128_v13 = vpop.eup %4127 }
0x29d4   : > { %v3081_v49 = vmul.f32 %v4128_v13, %v4126_v46 }
0x29d6   : > { %3882 = vmatmul.mubr.msk.f32.vlgmr.msra.gmra.mrb[34].mxu1 %vm213_vm1, %v3081_v49 }
0x29d7   : > { %4010 = vmatpush3.bf16.msra.mxu1 %v4289_v4  ;;  %3892 = vmatprep.mubr.msk.f32.mxu1 %vm4198_vm0, %v4197_v1 }
0x29d8   : > { %4011 = vmatprep.subr.bf16.mxu1 %v4199_v3 }
0x29db   : > { %4013 = vmatpush3.bf16.msra.mxu1 %v4312_v9 }
0x2aa9   : > { %v3151_v50 = vpop.f32.mrb[34].mxu1 }
0x2aaa   : > { %v3155_v51 = vmul.f32 %v3151_v50, %v3151_v50  ;;  %v3883_v52 = vpop.f32.mrb[35].mxu1 }
0x2aac   : > { %3893 = vmatmul.mubr.msk.f32.vlgmr.msra.gmra.mrb[36].mxu1 %vm292_vm2, %v3155_v51  ;;  %vm3314_vm2 = vcmask 253952  }
0x2b7f   : > { %v3225_v53 = vpop.f32.mrb[36].mxu1 }
0x2b80   : > { %v3229_v54 = vadd.f32 1e-12, %v3225_v53  ;;  %v3894_v55 = vpop.f32.mrb[37].mxu1  ;;  %v3237_v56 = vadd.f32 1.0, %v3225_v53 }
0x2b82   : > { %4129 = vrsqrt.f32 %v3229_v54  ;;  %vm3232_vm0 = vcmp.eq.f32.partialorder %v3229_v54, inf  ;;  %v3235_v1 = vand.u32 2147483648, %v3229_v54  ;;  %vm3234_vm1 = vcmp.eq.f32.partialorder %v3229_v54, 0.0 }
0x2b83   : > { %4131 = vrcp.f32 %v3237_v56 }
0x2b8c   : > { %v4130_v4 = vpop.eup %4129 }
0x2b8d   : > { %v3231_v57 = vmul.f32 %v4130_v4, %v3229_v54  ;;  %v4132_v9 = vpop.eup %4131 }
0x2b8f   : > { %v3233_v3 = vsel %vm3232_vm0, %v3229_v54, %v3231_v57 }
0x2b90   : > { %v3236_v58 = vsel %vm3234_vm1, %v3235_v1, %v3233_v3 }
0x2b91   : > { %v3239_v59 = vmul.f32 %v4132_v9, %v3236_v58 }
0x2b93   : > { %3898 = vmatmul.mubr.msk.f32.vlgmr.msra.gmra.mrb[38].mxu0 %vm378_vm6, %v3239_v59 }
0x2c66   : > { %v3309_v60 = vpop.f32.mrb[38].mxu0 }
0x2c67   : > { %v3313_v61 = vmul.f32 %v3309_v60, %v3151_v50  ;;  %v3899_v62 = vpop.f32.mrb[39].mxu0 }
0x2c69   : > { %3315 = vst.msk [vmem:[%s202_s5] sm:$0x1] %vm3314_vm2, %v3313_v61 }
0x2c6a   : > { %4146 = shalt.err (!%p4143_p3)
}
0x2c6b   : > { %s4147_s14 = scalar_lea.hbm %s4580_s9, 16  ;;  %s4151_s23 = scalar_lea.hbm %s4626_s4, 48 }
0x2c6c   : > { %p4148_p4 = scmp.ne.s32.totalorder %s4580_s9, %s4147_s14  ;;  %p4152_p9 = scmp.lt.u32.totalorder %s4580_s9, %s4626_s4 }
0x2c6d   : > { %p4153_p10 = scmp.lt.u32.totalorder %s4151_s23, %s4147_s14  ;;  %p4155_p12 = scmp.lt.u32.totalorder %s4147_s14, %s4580_s9 }
0x2c6e   : > { %p4149_p7 = pnand %p4148_p4, %p4265_p5 }
0x2c6f   : > { %p4154_p11 = por %p4153_p10, %p4152_p9 }
0x2c70   : > { %p4150_p8 = pneg %p4149_p7 }
0x2c71   : > { %p4156_p13 = por %p4155_p12, %p4154_p11 }
0x2c73   : > { %p4157_p0 = pnand %p4156_p13, %p4150_p8 }
0x2c75   : > { %4160 = shalt.err (!%p4157_p0)
}
0x2c76   : > { %4014 = dma.vmem_to_hbm [thread:$0]  (%p4265_p5), %s4582_s6, 16, %s4580_s9, %s3317_s10  }
0x2c77 PF: > { %p4020_p1 = scmp.ge.s32.totalorder %s4195_s18, 2  ;;  %s3341_s29 = sand.u32 1, %s4183_s15  }
0x2c78   : > { %s3342_s30 = scalar_lea.sflag [#allocation3], %s3341_s29 }
0x2c79   : > { %p4017_p2 = pnand %p4020_p1, %p4269_p6 }
0x2c7b   : > { %4178 = dma.done.wait (!%p4017_p2), %s3342_s30, 16  }
0x2c7c   : > { %4180 = vsyncadd (!%p4017_p2), %s3342_s30, 4294967280  ;;  %p14_p3 = scmp.ge.s32.totalorder %s4252_s21, 5   ;;  %s4629_s15 = smov %s4187_s16 }
0x2c7d   : > { %s4630_s16 = smov %s4191_s17  ;;  %s4631_s17 = smov %s4263_s24 }
0x2c7e   : > { %s4632_s18 = smov %s4252_s21  ;;  %16 = sbr.rel (!%p14_p3) target bundleno = 3 (0x3), region = 74 }
0x2c85   :  { %3346 = vsyncpa [#allocation3], 1 }
0x2c86   :  { %3348 = vsyncpa [#allocation3 + $0x1], 1 }

</bundles_post_ra>
